<compile_context>
chip_gen: v6e
topology: v6e:2x2x1
jax: 0.10.0
libtpu: 0.0.40
codegen_flags: <defaults>
</compile_context>

<pallas_src>
import functools

import jax
import jax.numpy as jnp
from jax.experimental import pallas as pl
from jax.experimental.pallas import tpu as pltpu

_H1 = 1024       # fc1 output features
_H2 = 64         # fc2 output features (folded away inside the kernel)
_BN_EPS = 1e-5
_TN = 256        # fc1 feature tile (multiple of 128; 2 bufs of (D0, TN) bf16 stay
                 # well under v7x's 32 MiB default scoped VMEM even at D0=6272)


def _disc_kernel(x_ref, w1_ref, gamma_ref, beta_ref, w23_ref, b23_ref,
                 o_ref, acc_ref):
    k = pl.program_id(0)

    @pl.when(k == 0)
    def _init():
        acc_ref[...] = jnp.zeros_like(acc_ref)

    # ---- fc1, this feature tile: (B, D0) @ (D0, TN) -> (B, TN)  (MXU, bf16 in / f32 acc)
    h = jnp.dot(x_ref[...], w1_ref[...], preferred_element_type=jnp.float32)
    # fc1's bias is intentionally omitted: training-mode BatchNorm subtracts the
    # per-feature batch mean right after, which cancels a constant bias exactly.

    # ---- BatchNorm1d (training mode, biased batch stats), single-pass variance ----
    mean = jnp.mean(h, axis=0, keepdims=True)                              # (1, TN)
    var = jnp.maximum(jnp.mean(h * h, axis=0, keepdims=True) - mean * mean, 0.0)
    h = (h - mean) * jax.lax.rsqrt(var + _BN_EPS)                          # EUP rsqrt
    h = h * gamma_ref[...] + beta_ref[...]

    # ---- LeakyReLU(0.1) (VPU) ----
    h = jnp.where(h >= 0, h, 0.1 * h)

    # ---- fused fc2·fc3 partial sum for this tile: (B, TN) @ (TN, 1) -> (B, 1) ----
    acc_ref[...] += jnp.dot(h, w23_ref[...], preferred_element_type=jnp.float32)

    @pl.when(k == pl.num_programs(0) - 1)
    def _finish():
        o_ref[...] = (acc_ref[...] + b23_ref[...]).astype(o_ref.dtype)


@functools.partial(jax.jit, static_argnames=("input_height", "input_width"))
def discriminator_forward(x, params, *, input_height, input_width):
    """x: (B, 128, H//4, W//4) float32 (NCHW feature map, as the torch .view implies)."""
    d0 = 128 * (input_height // 4) * (input_width // 4)
    b = x.shape[0]
    x2d = x.reshape(b, d0).astype(jnp.bfloat16)          # glue: torch .view + bf16 stream

    w1, b1, gamma, beta, w2, b2, w3, b3 = params
    del b1                                               # cancelled exactly by batch-norm
    w1_bf16 = w1.astype(jnp.bfloat16)
    # Fold fc3 into fc2 (no nonlinearity in between) — exact algebra, done in f32.
    w23 = w2.astype(jnp.float32) @ w3.astype(jnp.float32)          # (1024, 1)
    b23 = b2.astype(jnp.float32) @ w3.astype(jnp.float32) + b3     # (1, 1)

    n_tiles = _H1 // _TN
    cost = pl.CostEstimate(
        flops=2 * b * d0 * _H1 + 2 * b * _H1 + 10 * b * _H1,
        transcendentals=_H1,
        bytes_accessed=(w1_bf16.size * 2 + x2d.size * 2 + b * 4
                        + (gamma.size + beta.size + w23.size + b23.size) * 4),
    )

    out = pl.pallas_call(
        _disc_kernel,
        out_shape=jax.ShapeDtypeStruct((b, 1), jnp.float32),
        grid_spec=pltpu.PrefetchScalarGridSpec(
            num_scalar_prefetch=0,
            grid=(n_tiles,),
            in_specs=[
                pl.BlockSpec((b, d0), lambda k: (0, 0)),     # x      (resident, not re-DMAed)
                pl.BlockSpec((d0, _TN), lambda k: (0, k)),   # W1     (streamed, double-buffered)
                pl.BlockSpec((1, _TN), lambda k: (0, k)),    # gamma
                pl.BlockSpec((1, _TN), lambda k: (0, k)),    # beta
                pl.BlockSpec((_TN, 1), lambda k: (k, 0)),    # W23 = W2 @ W3
                pl.BlockSpec((1, 1), lambda k: (0, 0)),      # b23
            ],
            out_specs=pl.BlockSpec((b, 1), lambda k: (0, 0)),
            scratch_shapes=[pltpu.VMEM((b, 1), jnp.float32)],
        ),
        compiler_params=pltpu.CompilerParams(
            dimension_semantics=("arbitrary",),   # reduction axis (output revisited)
        ),
        cost_estimate=cost,
    )(x2d, w1_bf16, gamma, beta, w23, b23)
    # TODO(synk): BatchNorm1d running_mean/running_var updates (training bookkeeping)
    # are not produced; only the forward activation is computed.
    # TODO(synk): on v7x a 2nd-TC feature split would need a cross-core partial-sum
    # of the (B,1) accumulator (CMEM); omitted to keep the single-core kernel exact.
    return out


def init_params(key, d0):
    """Deterministic synthetic init (stand-in for utils.initialize_weights)."""
    ks = jax.random.split(key, 4)
    scale = 0.02
    w1 = scale * jax.random.normal(ks[0], (d0, _H1), jnp.float32)
    b1 = jnp.zeros((1, _H1), jnp.float32)
    gamma = jnp.ones((1, _H1), jnp.float32)
    beta = jnp.zeros((1, _H1), jnp.float32)
    w2 = scale * jax.random.normal(ks[1], (_H1, _H2), jnp.float32)
    b2 = jnp.zeros((1, _H2), jnp.float32)
    w3 = scale * jax.random.normal(ks[2], (_H2, 1), jnp.float32)
    b3 = jnp.zeros((1, 1), jnp.float32)
    return (w1, b1, gamma, beta, w2, b2, w3, b3)


def reference_forward(x, params, *, input_height, input_width):
    """Pure-JAX reference mirroring the torch module (training-mode BatchNorm).

    Uses the same bf16-rounded x / W1 that the kernel streams, so the comparison
    isolates kernel correctness from the (intentional) bf16 quantization.
    """
    d0 = 128 * (input_height // 4) * (input_width // 4)
    w1, b1, gamma, beta, w2, b2, w3, b3 = params
    xq = x.reshape(x.shape[0], d0).astype(jnp.bfloat16).astype(jnp.float32)
    w1q = w1.astype(jnp.bfloat16).astype(jnp.float32)
    h = xq @ w1q + b1                       # b1 kept here; BN cancels it exactly
    mean = jnp.mean(h, axis=0, keepdims=True)
    var = jnp.mean((h - mean) ** 2, axis=0, keepdims=True)
    h = (h - mean) * jax.lax.rsqrt(var + _BN_EPS) * gamma + beta
    h = jnp.where(h >= 0, h, 0.1 * h)
    h = h @ w2 + b2
    return h @ w3 + b3


if __name__ == "__main__":
    # Small, module-consistent shapes: height = width = 16 -> D0 = 128 * 4 * 4 = 2048.
    HEIGHT, WIDTH = 16, 16
    BATCH = 8
    D0 = 128 * (HEIGHT // 4) * (WIDTH // 4)

    key = jax.random.PRNGKey(0)
    kx, kp = jax.random.split(key)
    x = jax.random.normal(kx, (BATCH, 128, HEIGHT // 4, WIDTH // 4), jnp.float32)
    params = init_params(kp, D0)

    out = discriminator_forward(x, params, input_height=HEIGHT, input_width=WIDTH)
    out = jax.block_until_ready(out)
    assert out.shape == (BATCH, 1), out.shape

    ref = reference_forward(x, params, input_height=HEIGHT, input_width=WIDTH)
    assert jnp.allclose(out, ref, rtol=5e-3, atol=5e-3), (out, ref)

    print("KERNEL_OK")
</pallas_src>

<mosaic_0001>
module attributes {stable_mosaic.version = 11 : i64} {
  func.func @_disc_kernel(%arg0: i32, %arg1: memref<8x2048xbf16, #tpu.memory_space<vmem>>, %arg2: memref<2048x256xbf16, #tpu.memory_space<vmem>>, %arg3: memref<1x256xf32, #tpu.memory_space<vmem>>, %arg4: memref<1x256xf32, #tpu.memory_space<vmem>>, %arg5: memref<256x1xf32, #tpu.memory_space<vmem>>, %arg6: memref<1x1xf32, #tpu.memory_space<vmem>>, %arg7: memref<8x1xf32, #tpu.memory_space<vmem>>, %arg8: memref<8x1xf32, #tpu.memory_space<vmem>>) attributes {dimension_semantics = [#tpu.dimension_semantics<arbitrary>], iteration_bounds = array<i64: 4>, scalar_prefetch = 0 : i64, scratch_operands = 1 : i64, tpu.core_type = #tpu.core_type<tc>, window_params = [{pipeline_mode = #tpu.pipeline_mode<synchronous>, transform_indices = @transform_0, window_bounds = array<i64: 8, 2048>}, {transform_indices = @transform_1, window_bounds = array<i64: 2048, 256>}, {transform_indices = @transform_2, window_bounds = array<i64: 1, 256>}, {transform_indices = @transform_3, window_bounds = array<i64: 1, 256>}, {transform_indices = @transform_4, window_bounds = array<i64: 256, 1>}, {pipeline_mode = #tpu.pipeline_mode<synchronous>, transform_indices = @transform_5, window_bounds = array<i64: 1, 1>}, {pipeline_mode = #tpu.pipeline_mode<synchronous>, transform_indices = @transform_6, window_bounds = array<i64: 8, 1>}]} {
    %c0_i32 = arith.constant 0 : i32
    %0 = arith.cmpi eq, %arg0, %c0_i32 : i32
    %1 = arith.extui %0 : i1 to i32
    %c0_i32_0 = arith.constant 0 : i32
    %2 = arith.cmpi ne, %1, %c0_i32_0 : i32
    scf.if %2 {
      %cst_24 = arith.constant 0.000000e+00 : f32
      %45 = vector.broadcast %cst_24 : f32 to vector<8x1xf32>
      %c0_25 = arith.constant 0 : index
      %c0_26 = arith.constant 0 : index
      %46 = vector.load %arg8[%c0_25, %c0_26] : memref<8x1xf32, #tpu.memory_space<vmem>>, vector<8x1xf32>
      tpu.vector_store %arg8[%c0_25, %c0_26], %45 {strides = array<i32>} : memref<8x1xf32, #tpu.memory_space<vmem>>, vector<8x1xf32>,
    } else {
    }
    %c0 = arith.constant 0 : index
    %c0_1 = arith.constant 0 : index
    %3 = vector.load %arg1[%c0, %c0_1] : memref<8x2048xbf16, #tpu.memory_space<vmem>>, vector<8x2048xbf16>
    %c0_2 = arith.constant 0 : index
    %c0_3 = arith.constant 0 : index
    %4 = vector.load %arg2[%c0_2, %c0_3] : memref<2048x256xbf16, #tpu.memory_space<vmem>>, vector<2048x256xbf16>
    %cst = arith.constant dense<0.000000e+00> : vector<8x256xf32>
    %5 = tpu.matmul %3, %4, %cst {dimension_numbers = #tpu.dot_dimension_numbers<[1], [0], [0], [1], [0, 0, 1, 1], [], []>} : vector<8x2048xbf16>, vector<2048x256xbf16>, vector<8x256xf32> -> vector<8x256xf32>
    %cst_4 = arith.constant dense<0.000000e+00> : vector<256xf32>
    %6 = vector.multi_reduction <add>, %5, %cst_4 [0] : vector<8x256xf32> to vector<256xf32>
    %7 = vector.shape_cast %6 : vector<256xf32> to vector<1x256xf32>
    %cst_5 = arith.constant 8.000000e+00 : f32
    %8 = vector.broadcast %cst_5 : f32 to vector<1x256xf32>
    %9 = arith.divf %7, %8 : vector<1x256xf32>
    %10 = arith.mulf %5, %5 : vector<8x256xf32>
    %cst_6 = arith.constant dense<0.000000e+00> : vector<256xf32>
    %11 = vector.multi_reduction <add>, %10, %cst_6 [0] : vector<8x256xf32> to vector<256xf32>
    %12 = vector.shape_cast %11 : vector<256xf32> to vector<1x256xf32>
    %cst_7 = arith.constant 8.000000e+00 : f32
    %13 = vector.broadcast %cst_7 : f32 to vector<1x256xf32>
    %14 = arith.divf %12, %13 : vector<1x256xf32>
    %15 = arith.mulf %9, %9 : vector<1x256xf32>
    %16 = arith.subf %14, %15 : vector<1x256xf32>
    %cst_8 = arith.constant 0.000000e+00 : f32
    %17 = vector.broadcast %cst_8 : f32 to vector<1x256xf32>
    %18 = arith.maximumf %16, %17 : vector<1x256xf32>
    %19 = vector.broadcast %9 : vector<1x256xf32> to vector<8x256xf32>
    %20 = arith.subf %5, %19 : vector<8x256xf32>
    %cst_9 = arith.constant 9.99999974E-6 : f32
    %21 = vector.broadcast %cst_9 : f32 to vector<1x256xf32>
    %22 = arith.addf %18, %21 : vector<1x256xf32>
    %23 = math.rsqrt %22 : vector<1x256xf32>
    %24 = vector.broadcast %23 : vector<1x256xf32> to vector<8x256xf32>
    %25 = arith.mulf %20, %24 : vector<8x256xf32>
    %c0_10 = arith.constant 0 : index
    %c0_11 = arith.constant 0 : index
    %26 = vector.load %arg3[%c0_10, %c0_11] : memref<1x256xf32, #tpu.memory_space<vmem>>, vector<1x256xf32>
    %27 = vector.broadcast %26 : vector<1x256xf32> to vector<8x256xf32>
    %28 = arith.mulf %25, %27 : vector<8x256xf32>
    %c0_12 = arith.constant 0 : index
    %c0_13 = arith.constant 0 : index
    %29 = vector.load %arg4[%c0_12, %c0_13] : memref<1x256xf32, #tpu.memory_space<vmem>>, vector<1x256xf32>
    %30 = vector.broadcast %29 : vector<1x256xf32> to vector<8x256xf32>
    %31 = arith.addf %28, %30 : vector<8x256xf32>
    %cst_14 = arith.constant 0.000000e+00 : f32
    %32 = vector.broadcast %cst_14 : f32 to vector<8x256xf32>
    %33 = arith.cmpf oge, %31, %32 : vector<8x256xf32>
    %cst_15 = arith.constant 1.000000e-01 : f32
    %34 = vector.broadcast %cst_15 : f32 to vector<8x256xf32>
    %35 = arith.mulf %34, %31 : vector<8x256xf32>
    %36 = arith.select %33, %31, %35 : vector<8x256xi1>, vector<8x256xf32>
    %c0_16 = arith.constant 0 : index
    %c0_17 = arith.constant 0 : index
    %37 = vector.load %arg8[%c0_16, %c0_17] : memref<8x1xf32, #tpu.memory_space<vmem>>, vector<8x1xf32>
    %c0_18 = arith.constant 0 : index
    %c0_19 = arith.constant 0 : index
    %38 = vector.load %arg5[%c0_18, %c0_19] : memref<256x1xf32, #tpu.memory_space<vmem>>, vector<256x1xf32>
    %cst_20 = arith.constant dense<0.000000e+00> : vector<8x1xf32>
    %39 = tpu.matmul %36, %38, %cst_20 {dimension_numbers = #tpu.dot_dimension_numbers<[1], [0], [0], [1], [0, 0, 1, 1], [], []>} : vector<8x256xf32>, vector<256x1xf32>, vector<8x1xf32> -> vector<8x1xf32>
    %40 = arith.addf %37, %39 : vector<8x1xf32>
    %c0_21 = arith.constant 0 : index
    %c0_22 = arith.constant 0 : index
    %41 = vector.load %arg8[%c0_21, %c0_22] : memref<8x1xf32, #tpu.memory_space<vmem>>, vector<8x1xf32>
    tpu.vector_store %arg8[%c0_21, %c0_22], %40 {strides = array<i32>} : memref<8x1xf32, #tpu.memory_space<vmem>>, vector<8x1xf32>,
    %c3_i32 = arith.constant 3 : i32
    %42 = arith.cmpi eq, %arg0, %c3_i32 : i32
    %43 = arith.extui %42 : i1 to i32
    %c0_i32_23 = arith.constant 0 : i32
    %44 = arith.cmpi ne, %43, %c0_i32_23 : i32
    scf.if %44 {
      %c0_24 = arith.constant 0 : index
      %c0_25 = arith.constant 0 : index
      %45 = vector.load %arg8[%c0_24, %c0_25] : memref<8x1xf32, #tpu.memory_space<vmem>>, vector<8x1xf32>
      %c0_26 = arith.constant 0 : index
      %c0_27 = arith.constant 0 : index
      %46 = vector.load %arg6[%c0_26, %c0_27] : memref<1x1xf32, #tpu.memory_space<vmem>>, vector<1x1xf32>
      %47 = vector.broadcast %46 : vector<1x1xf32> to vector<8x1xf32>
      %48 = arith.addf %45, %47 : vector<8x1xf32>
      %c0_28 = arith.constant 0 : index
      %c0_29 = arith.constant 0 : index
      %49 = vector.load %arg7[%c0_28, %c0_29] : memref<8x1xf32, #tpu.memory_space<vmem>>, vector<8x1xf32>
      tpu.vector_store %arg7[%c0_28, %c0_29], %48 {strides = array<i32>} : memref<8x1xf32, #tpu.memory_space<vmem>>, vector<8x1xf32>,
    } else {
    }
    return
  }
  func.func @transform_0(%arg0: i32) -> (i32, i32) {
    %c0_i32 = arith.constant 0 : i32
    %c0_i32_0 = arith.constant 0 : i32
    %c0_i32_1 = arith.constant 0 : i32
    return %c0_i32, %c0_i32_0 : i32, i32
  }
  func.func @transform_1(%arg0: i32) -> (i32, i32) {
    %c0_i32 = arith.constant 0 : i32
    %c0_i32_0 = arith.constant 0 : i32
    return %c0_i32, %arg0 : i32, i32
  }
  func.func @transform_2(%arg0: i32) -> (i32, i32) {
    %c0_i32 = arith.constant 0 : i32
    %c0_i32_0 = arith.constant 0 : i32
    return %c0_i32, %arg0 : i32, i32
  }
  func.func @transform_3(%arg0: i32) -> (i32, i32) {
    %c0_i32 = arith.constant 0 : i32
    %c0_i32_0 = arith.constant 0 : i32
    return %c0_i32, %arg0 : i32, i32
  }
  func.func @transform_4(%arg0: i32) -> (i32, i32) {
    %c0_i32 = arith.constant 0 : i32
    %c0_i32_0 = arith.constant 0 : i32
    return %arg0, %c0_i32 : i32, i32
  }
  func.func @transform_5(%arg0: i32) -> (i32, i32) {
    %c0_i32 = arith.constant 0 : i32
    %c0_i32_0 = arith.constant 0 : i32
    %c0_i32_1 = arith.constant 0 : i32
    return %c0_i32, %c0_i32_0 : i32, i32
  }
  func.func @transform_6(%arg0: i32) -> (i32, i32) {
    %c0_i32 = arith.constant 0 : i32
    %c0_i32_0 = arith.constant 0 : i32
    %c0_i32_1 = arith.constant 0 : i32
    return %c0_i32, %c0_i32_0 : i32, i32
  }
}

</mosaic_0001>

<bundles_post_ra>
// kernel: discriminator_forward.1
= control target key start
LH: loop header
LB: loop body
LE: loop exit
PB: predicated region body
PF: predicated region fallthrough
CT: control target
= control target key end

     0   :  { %s5323_s0 = inlined_call_operand.vmem [shape: bf16[8,2048], index: 0, kind: input, shape index: {}]   ;;  %s5324_s1 = inlined_call_operand.vmem [shape: bf16[2048,1024], index: 1, kind: input, shape index: {}]   ;;  %s5325_s2 = inlined_call_operand.vmem [shape: f32[1,1024], index: 2, kind: input, shape index: {}]   ;;  %s5326_s3 = inlined_call_operand.vmem [shape: f32[1,1024], index: 3, kind: input, shape index: {}]   ;;  %s5327_s4 = inlined_call_operand.vmem [shape: f32[1024,1], index: 4, kind: input, shape index: {}]   ;;  %s5328_s5 = inlined_call_operand.<no memory space> [shape: f32[1,1], index: 5, kind: input, shape index: {}]   ;;  %s5329_s6 = inlined_call_operand.vmem [shape: f32[8,1], index: 6, kind: output, shape index: {}]  }
   0x1   :  { %v11_v0 = vstv %s5328_s5 }
   0x2   :  { %12 = vst [vmem:[#allocation3] sm:$0x1] %v11_v0 }
   0x3   :  { %s4370_s23 = smov 0   ;;  %s4372_s24 = smov 0  }
   0x4   :  { %s4374_s25 = smov 0  }
   0x5 LB: > { %s4386_s5 = sadd.s32 4294967295, %s4329_s25   ;;  %s4389_s26 = sadd.s32 1, %s4329_s25   ;;  %s4329_s25 = sphi %s4374_s25, %s5332_s25   ;;  %s4325_s24 = sphi %s4372_s24, %s5331_s24   ;;  %s4321_s23 = sphi %s4370_s23, %s5330_s23  }
   0x6   : > { %s43_s27 = ssub.s32 %s4329_s25, %s4389_s26  ;;  %s46_s28 = sadd.s32 1, %s4325_s24 }
   0x7   : > { %p44_p0 = scmp.eq.s32.totalorder %s43_s27, 0  ;;  %p53_p1 = scmp.ne.s32.totalorder %s4325_s24, %s4321_s23 }
   0x8   : > { %p54_p2 = scmp.eq.s32.totalorder %s4329_s25, 0  ;;  %p3555_p4 = scmp.ge.s32.totalorder %s4329_s25, 4 }
   0x9   : > { %s4398_s29 = scalar_select %p44_p0, %s4325_s24, %s46_s28  }
   0xa   : > { %p55_p3 = por %p54_p2, %p53_p1  ;;  %205 = sbr.rel (%p3555_p4) target bundleno = 275 (0x113), region = 24 }
   0xf   : > { %208 = sbr.rel (!%p55_p3) target bundleno = 275 (0x113), region = 28  ;;  %s210_s30 = sand.u32 (%p55_p3), 1, %s4325_s24  }
  0x10   : > { %s3842_s7 = sshll.u32 (%p55_p3), %s4329_s25, 3  ;;  %s3556_s8 = sshll.u32 (%p55_p3), %s210_s30, 11 }
  0x11   : > { %s4406_s11 = scalar_lea.vmem (%p55_p3), %s5324_s1, %s3842_s7  ;;  %s4411_s12 = scalar_lea.vmem (%p55_p3), [#allocation4], %s3556_s8 }
  0x12   : > { %v754_v1 = vld [vmem:[%s4406_s11] sm:$0xff] (%p55_p3) }
  0x13   : > { %v756_v2 = vld [vmem:[%s4406_s11 + $0x20] sm:$0xff] (%p55_p3)  ;;  %755 = vst [vmem:[%s4411_s12] sm:$0xff] (%p55_p3), %v754_v1 }
  0x14   : > { %v758_v3 = vld [vmem:[%s4406_s11 + $0x40] sm:$0xff]  ;;  %757 = vst [vmem:[%s4411_s12 + $0x8] sm:$0xff] %v756_v2 }
  0x15   : > { %759 = vst [vmem:[%s4411_s12 + $0x10] sm:$0xff] %v758_v3  ;;  %v760_v4 = vld [vmem:[%s4406_s11 + $0x60] sm:$0xff] }
  0x16   : > { %v762_v5 = vld [vmem:[%s4406_s11 + $0x80] sm:$0xff]  ;;  %761 = vst [vmem:[%s4411_s12 + $0x18] sm:$0xff] %v760_v4 }
  0x17   : > { %v764_v6 = vld [vmem:[%s4406_s11 + $0xa0] sm:$0xff]  ;;  %763 = vst [vmem:[%s4411_s12 + $0x20] sm:$0xff] %v762_v5 }
  0x18   : > { %765 = vst [vmem:[%s4411_s12 + $0x28] sm:$0xff] %v764_v6  ;;  %v766_v7 = vld [vmem:[%s4406_s11 + $0xc0] sm:$0xff] }
  0x19   : > { %v768_v8 = vld [vmem:[%s4406_s11 + $0xe0] sm:$0xff]  ;;  %767 = vst [vmem:[%s4411_s12 + $0x30] sm:$0xff] %v766_v7 }
  0x1a   : > { %v770_v9 = vld [vmem:[%s4406_s11 + $0x100] sm:$0xff]  ;;  %769 = vst [vmem:[%s4411_s12 + $0x38] sm:$0xff] %v768_v8 }
  0x1b   : > { %771 = vst [vmem:[%s4411_s12 + $0x40] sm:$0xff] %v770_v9  ;;  %v772_v10 = vld [vmem:[%s4406_s11 + $0x120] sm:$0xff] }
  0x1c   : > { %v774_v11 = vld [vmem:[%s4406_s11 + $0x140] sm:$0xff]  ;;  %773 = vst [vmem:[%s4411_s12 + $0x48] sm:$0xff] %v772_v10 }
  0x1d   : > { %v776_v12 = vld [vmem:[%s4406_s11 + $0x160] sm:$0xff]  ;;  %775 = vst [vmem:[%s4411_s12 + $0x50] sm:$0xff] %v774_v11 }
  0x1e   : > { %777 = vst [vmem:[%s4411_s12 + $0x58] sm:$0xff] %v776_v12  ;;  %v778_v13 = vld [vmem:[%s4406_s11 + $0x180] sm:$0xff] }
  0x1f   : > { %v780_v14 = vld [vmem:[%s4406_s11 + $0x1a0] sm:$0xff]  ;;  %779 = vst [vmem:[%s4411_s12 + $0x60] sm:$0xff] %v778_v13 }
  0x20   : > { %v782_v15 = vld [vmem:[%s4406_s11 + $0x1c0] sm:$0xff]  ;;  %781 = vst [vmem:[%s4411_s12 + $0x68] sm:$0xff] %v780_v14 }
  0x21   : > { %783 = vst [vmem:[%s4411_s12 + $0x70] sm:$0xff] %v782_v15  ;;  %v784_v16 = vld [vmem:[%s4406_s11 + $0x1e0] sm:$0xff] }
  0x22   : > { %v786_v17 = vld [vmem:[%s4406_s11 + $0x200] sm:$0xff]  ;;  %785 = vst [vmem:[%s4411_s12 + $0x78] sm:$0xff] %v784_v16 }
  0x23   : > { %v788_v18 = vld [vmem:[%s4406_s11 + $0x220] sm:$0xff]  ;;  %787 = vst [vmem:[%s4411_s12 + $0x80] sm:$0xff] %v786_v17 }
  0x24   : > { %789 = vst [vmem:[%s4411_s12 + $0x88] sm:$0xff] %v788_v18  ;;  %v790_v19 = vld [vmem:[%s4406_s11 + $0x240] sm:$0xff] }
  0x25   : > { %v792_v20 = vld [vmem:[%s4406_s11 + $0x260] sm:$0xff]  ;;  %791 = vst [vmem:[%s4411_s12 + $0x90] sm:$0xff] %v790_v19 }
  0x26   : > { %v794_v21 = vld [vmem:[%s4406_s11 + $0x280] sm:$0xff]  ;;  %793 = vst [vmem:[%s4411_s12 + $0x98] sm:$0xff] %v792_v20 }
  0x27   : > { %795 = vst [vmem:[%s4411_s12 + $0xa0] sm:$0xff] %v794_v21  ;;  %v796_v22 = vld [vmem:[%s4406_s11 + $0x2a0] sm:$0xff] }
  0x28   : > { %v798_v23 = vld [vmem:[%s4406_s11 + $0x2c0] sm:$0xff]  ;;  %797 = vst [vmem:[%s4411_s12 + $0xa8] sm:$0xff] %v796_v22 }
  0x29   : > { %v800_v24 = vld [vmem:[%s4406_s11 + $0x2e0] sm:$0xff]  ;;  %799 = vst [vmem:[%s4411_s12 + $0xb0] sm:$0xff] %v798_v23 }
  0x2a   : > { %801 = vst [vmem:[%s4411_s12 + $0xb8] sm:$0xff] %v800_v24  ;;  %v802_v25 = vld [vmem:[%s4406_s11 + $0x300] sm:$0xff] }
  0x2b   : > { %v804_v26 = vld [vmem:[%s4406_s11 + $0x320] sm:$0xff]  ;;  %803 = vst [vmem:[%s4411_s12 + $0xc0] sm:$0xff] %v802_v25 }
  0x2c   : > { %v806_v27 = vld [vmem:[%s4406_s11 + $0x340] sm:$0xff]  ;;  %805 = vst [vmem:[%s4411_s12 + $0xc8] sm:$0xff] %v804_v26 }
  0x2d   : > { %807 = vst [vmem:[%s4411_s12 + $0xd0] sm:$0xff] %v806_v27  ;;  %v808_v28 = vld [vmem:[%s4406_s11 + $0x360] sm:$0xff] }
  0x2e   : > { %v810_v29 = vld [vmem:[%s4406_s11 + $0x380] sm:$0xff]  ;;  %809 = vst [vmem:[%s4411_s12 + $0xd8] sm:$0xff] %v808_v28 }
  0x2f   : > { %v812_v30 = vld [vmem:[%s4406_s11 + $0x3a0] sm:$0xff]  ;;  %811 = vst [vmem:[%s4411_s12 + $0xe0] sm:$0xff] %v810_v29 }
  0x30   : > { %813 = vst [vmem:[%s4411_s12 + $0xe8] sm:$0xff] %v812_v30  ;;  %v814_v31 = vld [vmem:[%s4406_s11 + $0x3c0] sm:$0xff] }
  0x31   : > { %v816_v32 = vld [vmem:[%s4406_s11 + $0x3e0] sm:$0xff]  ;;  %815 = vst [vmem:[%s4411_s12 + $0xf0] sm:$0xff] %v814_v31 }
  0x32   : > { %v818_v33 = vld [vmem:[%s4406_s11 + $0x400] sm:$0xff]  ;;  %817 = vst [vmem:[%s4411_s12 + $0xf8] sm:$0xff] %v816_v32 }
  0x33   : > { %819 = vst [vmem:[%s4411_s12 + $0x100] sm:$0xff] %v818_v33  ;;  %v820_v34 = vld [vmem:[%s4406_s11 + $0x420] sm:$0xff] }
  0x34   : > { %v822_v35 = vld [vmem:[%s4406_s11 + $0x440] sm:$0xff]  ;;  %821 = vst [vmem:[%s4411_s12 + $0x108] sm:$0xff] %v820_v34 }
  0x35   : > { %v824_v36 = vld [vmem:[%s4406_s11 + $0x460] sm:$0xff]  ;;  %823 = vst [vmem:[%s4411_s12 + $0x110] sm:$0xff] %v822_v35 }
  0x36   : > { %825 = vst [vmem:[%s4411_s12 + $0x118] sm:$0xff] %v824_v36  ;;  %v826_v37 = vld [vmem:[%s4406_s11 + $0x480] sm:$0xff] }
  0x37   : > { %v828_v38 = vld [vmem:[%s4406_s11 + $0x4a0] sm:$0xff]  ;;  %827 = vst [vmem:[%s4411_s12 + $0x120] sm:$0xff] %v826_v37 }
  0x38   : > { %v830_v39 = vld [vmem:[%s4406_s11 + $0x4c0] sm:$0xff]  ;;  %829 = vst [vmem:[%s4411_s12 + $0x128] sm:$0xff] %v828_v38 }
  0x39   : > { %831 = vst [vmem:[%s4411_s12 + $0x130] sm:$0xff] %v830_v39  ;;  %v832_v40 = vld [vmem:[%s4406_s11 + $0x4e0] sm:$0xff] }
  0x3a   : > { %v834_v41 = vld [vmem:[%s4406_s11 + $0x500] sm:$0xff]  ;;  %833 = vst [vmem:[%s4411_s12 + $0x138] sm:$0xff] %v832_v40 }
  0x3b   : > { %v836_v42 = vld [vmem:[%s4406_s11 + $0x520] sm:$0xff]  ;;  %835 = vst [vmem:[%s4411_s12 + $0x140] sm:$0xff] %v834_v41 }
  0x3c   : > { %837 = vst [vmem:[%s4411_s12 + $0x148] sm:$0xff] %v836_v42  ;;  %v838_v43 = vld [vmem:[%s4406_s11 + $0x540] sm:$0xff] }
  0x3d   : > { %v840_v44 = vld [vmem:[%s4406_s11 + $0x560] sm:$0xff]  ;;  %839 = vst [vmem:[%s4411_s12 + $0x150] sm:$0xff] %v838_v43 }
  0x3e   : > { %v842_v45 = vld [vmem:[%s4406_s11 + $0x580] sm:$0xff]  ;;  %841 = vst [vmem:[%s4411_s12 + $0x158] sm:$0xff] %v840_v44 }
  0x3f   : > { %843 = vst [vmem:[%s4411_s12 + $0x160] sm:$0xff] %v842_v45  ;;  %v844_v46 = vld [vmem:[%s4406_s11 + $0x5a0] sm:$0xff] }
  0x40   : > { %v846_v47 = vld [vmem:[%s4406_s11 + $0x5c0] sm:$0xff]  ;;  %845 = vst [vmem:[%s4411_s12 + $0x168] sm:$0xff] %v844_v46 }
  0x41   : > { %v848_v48 = vld [vmem:[%s4406_s11 + $0x5e0] sm:$0xff]  ;;  %847 = vst [vmem:[%s4411_s12 + $0x170] sm:$0xff] %v846_v47 }
  0x42   : > { %849 = vst [vmem:[%s4411_s12 + $0x178] sm:$0xff] %v848_v48  ;;  %v850_v49 = vld [vmem:[%s4406_s11 + $0x600] sm:$0xff] }
  0x43   : > { %v852_v50 = vld [vmem:[%s4406_s11 + $0x620] sm:$0xff]  ;;  %851 = vst [vmem:[%s4411_s12 + $0x180] sm:$0xff] %v850_v49 }
  0x44   : > { %v854_v51 = vld [vmem:[%s4406_s11 + $0x640] sm:$0xff]  ;;  %853 = vst [vmem:[%s4411_s12 + $0x188] sm:$0xff] %v852_v50 }
  0x45   : > { %855 = vst [vmem:[%s4411_s12 + $0x190] sm:$0xff] %v854_v51  ;;  %v856_v52 = vld [vmem:[%s4406_s11 + $0x660] sm:$0xff] }
  0x46   : > { %v858_v53 = vld [vmem:[%s4406_s11 + $0x680] sm:$0xff]  ;;  %857 = vst [vmem:[%s4411_s12 + $0x198] sm:$0xff] %v856_v52 }
  0x47   : > { %v860_v54 = vld [vmem:[%s4406_s11 + $0x6a0] sm:$0xff]  ;;  %859 = vst [vmem:[%s4411_s12 + $0x1a0] sm:$0xff] %v858_v53 }
  0x48   : > { %861 = vst [vmem:[%s4411_s12 + $0x1a8] sm:$0xff] %v860_v54  ;;  %v862_v55 = vld [vmem:[%s4406_s11 + $0x6c0] sm:$0xff] }
  0x49   : > { %v864_v56 = vld [vmem:[%s4406_s11 + $0x6e0] sm:$0xff]  ;;  %863 = vst [vmem:[%s4411_s12 + $0x1b0] sm:$0xff] %v862_v55 }
  0x4a   : > { %v866_v57 = vld [vmem:[%s4406_s11 + $0x700] sm:$0xff]  ;;  %865 = vst [vmem:[%s4411_s12 + $0x1b8] sm:$0xff] %v864_v56 }
  0x4b   : > { %867 = vst [vmem:[%s4411_s12 + $0x1c0] sm:$0xff] %v866_v57  ;;  %v868_v58 = vld [vmem:[%s4406_s11 + $0x720] sm:$0xff] }
  0x4c   : > { %v870_v59 = vld [vmem:[%s4406_s11 + $0x740] sm:$0xff]  ;;  %869 = vst [vmem:[%s4411_s12 + $0x1c8] sm:$0xff] %v868_v58 }
  0x4d   : > { %v872_v60 = vld [vmem:[%s4406_s11 + $0x760] sm:$0xff]  ;;  %871 = vst [vmem:[%s4411_s12 + $0x1d0] sm:$0xff] %v870_v59 }
  0x4e   : > { %873 = vst [vmem:[%s4411_s12 + $0x1d8] sm:$0xff] %v872_v60  ;;  %v874_v61 = vld [vmem:[%s4406_s11 + $0x780] sm:$0xff] }
  0x4f   : > { %v876_v62 = vld [vmem:[%s4406_s11 + $0x7a0] sm:$0xff]  ;;  %875 = vst [vmem:[%s4411_s12 + $0x1e0] sm:$0xff] %v874_v61 }
  0x50   : > { %v878_v63 = vld [vmem:[%s4406_s11 + $0x7c0] sm:$0xff]  ;;  %877 = vst [vmem:[%s4411_s12 + $0x1e8] sm:$0xff] %v876_v62 }
  0x51   : > { %879 = vst [vmem:[%s4411_s12 + $0x1f0] sm:$0xff] %v878_v63  ;;  %v880_v0 = vld [vmem:[%s4406_s11 + $0x7e0] sm:$0xff] }
  0x52   : > { %v882_v1 = vld [vmem:[%s4406_s11 + $0x800] sm:$0xff]  ;;  %881 = vst [vmem:[%s4411_s12 + $0x1f8] sm:$0xff] %v880_v0 }
  0x53   : > { %v884_v2 = vld [vmem:[%s4406_s11 + $0x820] sm:$0xff]  ;;  %883 = vst [vmem:[%s4411_s12 + $0x200] sm:$0xff] %v882_v1 }
  0x54   : > { %885 = vst [vmem:[%s4411_s12 + $0x208] sm:$0xff] %v884_v2  ;;  %v886_v3 = vld [vmem:[%s4406_s11 + $0x840] sm:$0xff] }
  0x55   : > { %v888_v4 = vld [vmem:[%s4406_s11 + $0x860] sm:$0xff]  ;;  %887 = vst [vmem:[%s4411_s12 + $0x210] sm:$0xff] %v886_v3 }
  0x56   : > { %v890_v5 = vld [vmem:[%s4406_s11 + $0x880] sm:$0xff]  ;;  %889 = vst [vmem:[%s4411_s12 + $0x218] sm:$0xff] %v888_v4 }
  0x57   : > { %891 = vst [vmem:[%s4411_s12 + $0x220] sm:$0xff] %v890_v5  ;;  %v892_v6 = vld [vmem:[%s4406_s11 + $0x8a0] sm:$0xff] }
  0x58   : > { %v894_v7 = vld [vmem:[%s4406_s11 + $0x8c0] sm:$0xff]  ;;  %893 = vst [vmem:[%s4411_s12 + $0x228] sm:$0xff] %v892_v6 }
  0x59   : > { %v896_v8 = vld [vmem:[%s4406_s11 + $0x8e0] sm:$0xff]  ;;  %895 = vst [vmem:[%s4411_s12 + $0x230] sm:$0xff] %v894_v7 }
  0x5a   : > { %897 = vst [vmem:[%s4411_s12 + $0x238] sm:$0xff] %v896_v8  ;;  %v898_v9 = vld [vmem:[%s4406_s11 + $0x900] sm:$0xff] }
  0x5b   : > { %v900_v10 = vld [vmem:[%s4406_s11 + $0x920] sm:$0xff]  ;;  %899 = vst [vmem:[%s4411_s12 + $0x240] sm:$0xff] %v898_v9 }
  0x5c   : > { %v902_v11 = vld [vmem:[%s4406_s11 + $0x940] sm:$0xff]  ;;  %901 = vst [vmem:[%s4411_s12 + $0x248] sm:$0xff] %v900_v10 }
  0x5d   : > { %903 = vst [vmem:[%s4411_s12 + $0x250] sm:$0xff] %v902_v11  ;;  %v904_v12 = vld [vmem:[%s4406_s11 + $0x960] sm:$0xff] }
  0x5e   : > { %v906_v13 = vld [vmem:[%s4406_s11 + $0x980] sm:$0xff]  ;;  %905 = vst [vmem:[%s4411_s12 + $0x258] sm:$0xff] %v904_v12 }
  0x5f   : > { %v908_v14 = vld [vmem:[%s4406_s11 + $0x9a0] sm:$0xff]  ;;  %907 = vst [vmem:[%s4411_s12 + $0x260] sm:$0xff] %v906_v13 }
  0x60   : > { %909 = vst [vmem:[%s4411_s12 + $0x268] sm:$0xff] %v908_v14  ;;  %v910_v15 = vld [vmem:[%s4406_s11 + $0x9c0] sm:$0xff] }
  0x61   : > { %v912_v16 = vld [vmem:[%s4406_s11 + $0x9e0] sm:$0xff]  ;;  %911 = vst [vmem:[%s4411_s12 + $0x270] sm:$0xff] %v910_v15 }
  0x62   : > { %v914_v17 = vld [vmem:[%s4406_s11 + $0xa00] sm:$0xff]  ;;  %913 = vst [vmem:[%s4411_s12 + $0x278] sm:$0xff] %v912_v16 }
  0x63   : > { %915 = vst [vmem:[%s4411_s12 + $0x280] sm:$0xff] %v914_v17  ;;  %v916_v18 = vld [vmem:[%s4406_s11 + $0xa20] sm:$0xff] }
  0x64   : > { %v918_v19 = vld [vmem:[%s4406_s11 + $0xa40] sm:$0xff]  ;;  %917 = vst [vmem:[%s4411_s12 + $0x288] sm:$0xff] %v916_v18 }
  0x65   : > { %v920_v20 = vld [vmem:[%s4406_s11 + $0xa60] sm:$0xff]  ;;  %919 = vst [vmem:[%s4411_s12 + $0x290] sm:$0xff] %v918_v19 }
  0x66   : > { %921 = vst [vmem:[%s4411_s12 + $0x298] sm:$0xff] %v920_v20  ;;  %v922_v21 = vld [vmem:[%s4406_s11 + $0xa80] sm:$0xff] }
  0x67   : > { %v924_v22 = vld [vmem:[%s4406_s11 + $0xaa0] sm:$0xff]  ;;  %923 = vst [vmem:[%s4411_s12 + $0x2a0] sm:$0xff] %v922_v21 }
  0x68   : > { %v926_v23 = vld [vmem:[%s4406_s11 + $0xac0] sm:$0xff]  ;;  %925 = vst [vmem:[%s4411_s12 + $0x2a8] sm:$0xff] %v924_v22 }
  0x69   : > { %927 = vst [vmem:[%s4411_s12 + $0x2b0] sm:$0xff] %v926_v23  ;;  %v928_v24 = vld [vmem:[%s4406_s11 + $0xae0] sm:$0xff] }
  0x6a   : > { %v930_v25 = vld [vmem:[%s4406_s11 + $0xb00] sm:$0xff]  ;;  %929 = vst [vmem:[%s4411_s12 + $0x2b8] sm:$0xff] %v928_v24 }
  0x6b   : > { %v932_v26 = vld [vmem:[%s4406_s11 + $0xb20] sm:$0xff]  ;;  %931 = vst [vmem:[%s4411_s12 + $0x2c0] sm:$0xff] %v930_v25 }
  0x6c   : > { %933 = vst [vmem:[%s4411_s12 + $0x2c8] sm:$0xff] %v932_v26  ;;  %v934_v27 = vld [vmem:[%s4406_s11 + $0xb40] sm:$0xff] }
  0x6d   : > { %v936_v28 = vld [vmem:[%s4406_s11 + $0xb60] sm:$0xff]  ;;  %935 = vst [vmem:[%s4411_s12 + $0x2d0] sm:$0xff] %v934_v27 }
  0x6e   : > { %v938_v29 = vld [vmem:[%s4406_s11 + $0xb80] sm:$0xff]  ;;  %937 = vst [vmem:[%s4411_s12 + $0x2d8] sm:$0xff] %v936_v28 }
  0x6f   : > { %939 = vst [vmem:[%s4411_s12 + $0x2e0] sm:$0xff] %v938_v29  ;;  %v940_v30 = vld [vmem:[%s4406_s11 + $0xba0] sm:$0xff] }
  0x70   : > { %v942_v31 = vld [vmem:[%s4406_s11 + $0xbc0] sm:$0xff]  ;;  %941 = vst [vmem:[%s4411_s12 + $0x2e8] sm:$0xff] %v940_v30 }
  0x71   : > { %v944_v32 = vld [vmem:[%s4406_s11 + $0xbe0] sm:$0xff]  ;;  %943 = vst [vmem:[%s4411_s12 + $0x2f0] sm:$0xff] %v942_v31 }
  0x72   : > { %945 = vst [vmem:[%s4411_s12 + $0x2f8] sm:$0xff] %v944_v32  ;;  %v946_v33 = vld [vmem:[%s4406_s11 + $0xc00] sm:$0xff] }
  0x73   : > { %v948_v34 = vld [vmem:[%s4406_s11 + $0xc20] sm:$0xff]  ;;  %947 = vst [vmem:[%s4411_s12 + $0x300] sm:$0xff] %v946_v33 }
  0x74   : > { %v950_v35 = vld [vmem:[%s4406_s11 + $0xc40] sm:$0xff]  ;;  %949 = vst [vmem:[%s4411_s12 + $0x308] sm:$0xff] %v948_v34 }
  0x75   : > { %951 = vst [vmem:[%s4411_s12 + $0x310] sm:$0xff] %v950_v35  ;;  %v952_v36 = vld [vmem:[%s4406_s11 + $0xc60] sm:$0xff] }
  0x76   : > { %v954_v37 = vld [vmem:[%s4406_s11 + $0xc80] sm:$0xff]  ;;  %953 = vst [vmem:[%s4411_s12 + $0x318] sm:$0xff] %v952_v36 }
  0x77   : > { %v956_v38 = vld [vmem:[%s4406_s11 + $0xca0] sm:$0xff]  ;;  %955 = vst [vmem:[%s4411_s12 + $0x320] sm:$0xff] %v954_v37 }
  0x78   : > { %957 = vst [vmem:[%s4411_s12 + $0x328] sm:$0xff] %v956_v38  ;;  %v958_v39 = vld [vmem:[%s4406_s11 + $0xcc0] sm:$0xff] }
  0x79   : > { %v960_v40 = vld [vmem:[%s4406_s11 + $0xce0] sm:$0xff]  ;;  %959 = vst [vmem:[%s4411_s12 + $0x330] sm:$0xff] %v958_v39 }
  0x7a   : > { %v962_v41 = vld [vmem:[%s4406_s11 + $0xd00] sm:$0xff]  ;;  %961 = vst [vmem:[%s4411_s12 + $0x338] sm:$0xff] %v960_v40 }
  0x7b   : > { %963 = vst [vmem:[%s4411_s12 + $0x340] sm:$0xff] %v962_v41  ;;  %v964_v42 = vld [vmem:[%s4406_s11 + $0xd20] sm:$0xff] }
  0x7c   : > { %v966_v43 = vld [vmem:[%s4406_s11 + $0xd40] sm:$0xff]  ;;  %965 = vst [vmem:[%s4411_s12 + $0x348] sm:$0xff] %v964_v42 }
  0x7d   : > { %v968_v44 = vld [vmem:[%s4406_s11 + $0xd60] sm:$0xff]  ;;  %967 = vst [vmem:[%s4411_s12 + $0x350] sm:$0xff] %v966_v43 }
  0x7e   : > { %969 = vst [vmem:[%s4411_s12 + $0x358] sm:$0xff] %v968_v44  ;;  %v970_v45 = vld [vmem:[%s4406_s11 + $0xd80] sm:$0xff] }
  0x7f   : > { %v972_v46 = vld [vmem:[%s4406_s11 + $0xda0] sm:$0xff]  ;;  %971 = vst [vmem:[%s4411_s12 + $0x360] sm:$0xff] %v970_v45 }
  0x80   : > { %v974_v47 = vld [vmem:[%s4406_s11 + $0xdc0] sm:$0xff]  ;;  %973 = vst [vmem:[%s4411_s12 + $0x368] sm:$0xff] %v972_v46 }
  0x81   : > { %975 = vst [vmem:[%s4411_s12 + $0x370] sm:$0xff] %v974_v47  ;;  %v976_v48 = vld [vmem:[%s4406_s11 + $0xde0] sm:$0xff] }
  0x82   : > { %v978_v49 = vld [vmem:[%s4406_s11 + $0xe00] sm:$0xff]  ;;  %977 = vst [vmem:[%s4411_s12 + $0x378] sm:$0xff] %v976_v48 }
  0x83   : > { %v980_v50 = vld [vmem:[%s4406_s11 + $0xe20] sm:$0xff]  ;;  %979 = vst [vmem:[%s4411_s12 + $0x380] sm:$0xff] %v978_v49 }
  0x84   : > { %981 = vst [vmem:[%s4411_s12 + $0x388] sm:$0xff] %v980_v50  ;;  %v982_v51 = vld [vmem:[%s4406_s11 + $0xe40] sm:$0xff] }
  0x85   : > { %v984_v52 = vld [vmem:[%s4406_s11 + $0xe60] sm:$0xff]  ;;  %983 = vst [vmem:[%s4411_s12 + $0x390] sm:$0xff] %v982_v51 }
  0x86   : > { %v986_v53 = vld [vmem:[%s4406_s11 + $0xe80] sm:$0xff]  ;;  %985 = vst [vmem:[%s4411_s12 + $0x398] sm:$0xff] %v984_v52 }
  0x87   : > { %987 = vst [vmem:[%s4411_s12 + $0x3a0] sm:$0xff] %v986_v53  ;;  %v988_v54 = vld [vmem:[%s4406_s11 + $0xea0] sm:$0xff] }
  0x88   : > { %v990_v55 = vld [vmem:[%s4406_s11 + $0xec0] sm:$0xff]  ;;  %989 = vst [vmem:[%s4411_s12 + $0x3a8] sm:$0xff] %v988_v54 }
  0x89   : > { %v992_v56 = vld [vmem:[%s4406_s11 + $0xee0] sm:$0xff]  ;;  %991 = vst [vmem:[%s4411_s12 + $0x3b0] sm:$0xff] %v990_v55 }
  0x8a   : > { %993 = vst [vmem:[%s4411_s12 + $0x3b8] sm:$0xff] %v992_v56  ;;  %v994_v57 = vld [vmem:[%s4406_s11 + $0xf00] sm:$0xff] }
  0x8b   : > { %v996_v58 = vld [vmem:[%s4406_s11 + $0xf20] sm:$0xff]  ;;  %995 = vst [vmem:[%s4411_s12 + $0x3c0] sm:$0xff] %v994_v57 }
  0x8c   : > { %v998_v59 = vld [vmem:[%s4406_s11 + $0xf40] sm:$0xff]  ;;  %997 = vst [vmem:[%s4411_s12 + $0x3c8] sm:$0xff] %v996_v58 }
  0x8d   : > { %999 = vst [vmem:[%s4411_s12 + $0x3d0] sm:$0xff] %v998_v59  ;;  %v1000_v60 = vld [vmem:[%s4406_s11 + $0xf60] sm:$0xff] }
  0x8e   : > { %v1002_v61 = vld [vmem:[%s4406_s11 + $0xf80] sm:$0xff]  ;;  %1001 = vst [vmem:[%s4411_s12 + $0x3d8] sm:$0xff] %v1000_v60 }
  0x8f   : > { %v1004_v62 = vld [vmem:[%s4406_s11 + $0xfa0] sm:$0xff]  ;;  %1003 = vst [vmem:[%s4411_s12 + $0x3e0] sm:$0xff] %v1002_v61 }
  0x90   : > { %1005 = vst [vmem:[%s4411_s12 + $0x3e8] sm:$0xff] %v1004_v62  ;;  %v1006_v63 = vld [vmem:[%s4406_s11 + $0xfc0] sm:$0xff] }
  0x91   : > { %v1008_v0 = vld [vmem:[%s4406_s11 + $0xfe0] sm:$0xff]  ;;  %1007 = vst [vmem:[%s4411_s12 + $0x3f0] sm:$0xff] %v1006_v63 }
  0x92   : > { %v1010_v1 = vld [vmem:[%s4406_s11 + $0x1000] sm:$0xff]  ;;  %1009 = vst [vmem:[%s4411_s12 + $0x3f8] sm:$0xff] %v1008_v0 }
  0x93   : > { %1011 = vst [vmem:[%s4411_s12 + $0x400] sm:$0xff] %v1010_v1  ;;  %v1012_v2 = vld [vmem:[%s4406_s11 + $0x1020] sm:$0xff] }
  0x94   : > { %v1014_v3 = vld [vmem:[%s4406_s11 + $0x1040] sm:$0xff]  ;;  %1013 = vst [vmem:[%s4411_s12 + $0x408] sm:$0xff] %v1012_v2 }
  0x95   : > { %v1016_v4 = vld [vmem:[%s4406_s11 + $0x1060] sm:$0xff]  ;;  %1015 = vst [vmem:[%s4411_s12 + $0x410] sm:$0xff] %v1014_v3 }
  0x96   : > { %1017 = vst [vmem:[%s4411_s12 + $0x418] sm:$0xff] %v1016_v4  ;;  %v1018_v5 = vld [vmem:[%s4406_s11 + $0x1080] sm:$0xff] }
  0x97   : > { %v1020_v6 = vld [vmem:[%s4406_s11 + $0x10a0] sm:$0xff]  ;;  %1019 = vst [vmem:[%s4411_s12 + $0x420] sm:$0xff] %v1018_v5 }
  0x98   : > { %v1022_v7 = vld [vmem:[%s4406_s11 + $0x10c0] sm:$0xff]  ;;  %1021 = vst [vmem:[%s4411_s12 + $0x428] sm:$0xff] %v1020_v6 }
  0x99   : > { %1023 = vst [vmem:[%s4411_s12 + $0x430] sm:$0xff] %v1022_v7  ;;  %v1024_v8 = vld [vmem:[%s4406_s11 + $0x10e0] sm:$0xff] }
  0x9a   : > { %v1026_v9 = vld [vmem:[%s4406_s11 + $0x1100] sm:$0xff]  ;;  %1025 = vst [vmem:[%s4411_s12 + $0x438] sm:$0xff] %v1024_v8 }
  0x9b   : > { %v1028_v10 = vld [vmem:[%s4406_s11 + $0x1120] sm:$0xff]  ;;  %1027 = vst [vmem:[%s4411_s12 + $0x440] sm:$0xff] %v1026_v9 }
  0x9c   : > { %1029 = vst [vmem:[%s4411_s12 + $0x448] sm:$0xff] %v1028_v10  ;;  %v1030_v11 = vld [vmem:[%s4406_s11 + $0x1140] sm:$0xff] }
  0x9d   : > { %v1032_v12 = vld [vmem:[%s4406_s11 + $0x1160] sm:$0xff]  ;;  %1031 = vst [vmem:[%s4411_s12 + $0x450] sm:$0xff] %v1030_v11 }
  0x9e   : > { %v1034_v13 = vld [vmem:[%s4406_s11 + $0x1180] sm:$0xff]  ;;  %1033 = vst [vmem:[%s4411_s12 + $0x458] sm:$0xff] %v1032_v12 }
  0x9f   : > { %1035 = vst [vmem:[%s4411_s12 + $0x460] sm:$0xff] %v1034_v13  ;;  %v1036_v14 = vld [vmem:[%s4406_s11 + $0x11a0] sm:$0xff] }
  0xa0   : > { %v1038_v15 = vld [vmem:[%s4406_s11 + $0x11c0] sm:$0xff]  ;;  %1037 = vst [vmem:[%s4411_s12 + $0x468] sm:$0xff] %v1036_v14 }
  0xa1   : > { %v1040_v16 = vld [vmem:[%s4406_s11 + $0x11e0] sm:$0xff]  ;;  %1039 = vst [vmem:[%s4411_s12 + $0x470] sm:$0xff] %v1038_v15 }
  0xa2   : > { %1041 = vst [vmem:[%s4411_s12 + $0x478] sm:$0xff] %v1040_v16  ;;  %v1042_v17 = vld [vmem:[%s4406_s11 + $0x1200] sm:$0xff] }
  0xa3   : > { %v1044_v18 = vld [vmem:[%s4406_s11 + $0x1220] sm:$0xff]  ;;  %1043 = vst [vmem:[%s4411_s12 + $0x480] sm:$0xff] %v1042_v17 }
  0xa4   : > { %v1046_v19 = vld [vmem:[%s4406_s11 + $0x1240] sm:$0xff]  ;;  %1045 = vst [vmem:[%s4411_s12 + $0x488] sm:$0xff] %v1044_v18 }
  0xa5   : > { %1047 = vst [vmem:[%s4411_s12 + $0x490] sm:$0xff] %v1046_v19  ;;  %v1048_v20 = vld [vmem:[%s4406_s11 + $0x1260] sm:$0xff] }
  0xa6   : > { %v1050_v21 = vld [vmem:[%s4406_s11 + $0x1280] sm:$0xff]  ;;  %1049 = vst [vmem:[%s4411_s12 + $0x498] sm:$0xff] %v1048_v20 }
  0xa7   : > { %v1052_v22 = vld [vmem:[%s4406_s11 + $0x12a0] sm:$0xff]  ;;  %1051 = vst [vmem:[%s4411_s12 + $0x4a0] sm:$0xff] %v1050_v21 }
  0xa8   : > { %1053 = vst [vmem:[%s4411_s12 + $0x4a8] sm:$0xff] %v1052_v22  ;;  %v1054_v23 = vld [vmem:[%s4406_s11 + $0x12c0] sm:$0xff] }
  0xa9   : > { %v1056_v24 = vld [vmem:[%s4406_s11 + $0x12e0] sm:$0xff]  ;;  %1055 = vst [vmem:[%s4411_s12 + $0x4b0] sm:$0xff] %v1054_v23 }
  0xaa   : > { %v1058_v25 = vld [vmem:[%s4406_s11 + $0x1300] sm:$0xff]  ;;  %1057 = vst [vmem:[%s4411_s12 + $0x4b8] sm:$0xff] %v1056_v24 }
  0xab   : > { %1059 = vst [vmem:[%s4411_s12 + $0x4c0] sm:$0xff] %v1058_v25  ;;  %v1060_v26 = vld [vmem:[%s4406_s11 + $0x1320] sm:$0xff] }
  0xac   : > { %v1062_v27 = vld [vmem:[%s4406_s11 + $0x1340] sm:$0xff]  ;;  %1061 = vst [vmem:[%s4411_s12 + $0x4c8] sm:$0xff] %v1060_v26 }
  0xad   : > { %v1064_v28 = vld [vmem:[%s4406_s11 + $0x1360] sm:$0xff]  ;;  %1063 = vst [vmem:[%s4411_s12 + $0x4d0] sm:$0xff] %v1062_v27 }
  0xae   : > { %1065 = vst [vmem:[%s4411_s12 + $0x4d8] sm:$0xff] %v1064_v28  ;;  %v1066_v29 = vld [vmem:[%s4406_s11 + $0x1380] sm:$0xff] }
  0xaf   : > { %v1068_v30 = vld [vmem:[%s4406_s11 + $0x13a0] sm:$0xff]  ;;  %1067 = vst [vmem:[%s4411_s12 + $0x4e0] sm:$0xff] %v1066_v29 }
  0xb0   : > { %v1070_v31 = vld [vmem:[%s4406_s11 + $0x13c0] sm:$0xff]  ;;  %1069 = vst [vmem:[%s4411_s12 + $0x4e8] sm:$0xff] %v1068_v30 }
  0xb1   : > { %1071 = vst [vmem:[%s4411_s12 + $0x4f0] sm:$0xff] %v1070_v31  ;;  %v1072_v32 = vld [vmem:[%s4406_s11 + $0x13e0] sm:$0xff] }
  0xb2   : > { %v1074_v33 = vld [vmem:[%s4406_s11 + $0x1400] sm:$0xff]  ;;  %1073 = vst [vmem:[%s4411_s12 + $0x4f8] sm:$0xff] %v1072_v32 }
  0xb3   : > { %v1076_v34 = vld [vmem:[%s4406_s11 + $0x1420] sm:$0xff]  ;;  %1075 = vst [vmem:[%s4411_s12 + $0x500] sm:$0xff] %v1074_v33 }
  0xb4   : > { %1077 = vst [vmem:[%s4411_s12 + $0x508] sm:$0xff] %v1076_v34  ;;  %v1078_v35 = vld [vmem:[%s4406_s11 + $0x1440] sm:$0xff] }
  0xb5   : > { %v1080_v36 = vld [vmem:[%s4406_s11 + $0x1460] sm:$0xff]  ;;  %1079 = vst [vmem:[%s4411_s12 + $0x510] sm:$0xff] %v1078_v35 }
  0xb6   : > { %v1082_v37 = vld [vmem:[%s4406_s11 + $0x1480] sm:$0xff]  ;;  %1081 = vst [vmem:[%s4411_s12 + $0x518] sm:$0xff] %v1080_v36 }
  0xb7   : > { %1083 = vst [vmem:[%s4411_s12 + $0x520] sm:$0xff] %v1082_v37  ;;  %v1084_v38 = vld [vmem:[%s4406_s11 + $0x14a0] sm:$0xff] }
  0xb8   : > { %v1086_v39 = vld [vmem:[%s4406_s11 + $0x14c0] sm:$0xff]  ;;  %1085 = vst [vmem:[%s4411_s12 + $0x528] sm:$0xff] %v1084_v38 }
  0xb9   : > { %v1088_v40 = vld [vmem:[%s4406_s11 + $0x14e0] sm:$0xff]  ;;  %1087 = vst [vmem:[%s4411_s12 + $0x530] sm:$0xff] %v1086_v39 }
  0xba   : > { %1089 = vst [vmem:[%s4411_s12 + $0x538] sm:$0xff] %v1088_v40  ;;  %v1090_v41 = vld [vmem:[%s4406_s11 + $0x1500] sm:$0xff] }
  0xbb   : > { %v1092_v42 = vld [vmem:[%s4406_s11 + $0x1520] sm:$0xff]  ;;  %1091 = vst [vmem:[%s4411_s12 + $0x540] sm:$0xff] %v1090_v41 }
  0xbc   : > { %v1094_v43 = vld [vmem:[%s4406_s11 + $0x1540] sm:$0xff]  ;;  %1093 = vst [vmem:[%s4411_s12 + $0x548] sm:$0xff] %v1092_v42 }
  0xbd   : > { %1095 = vst [vmem:[%s4411_s12 + $0x550] sm:$0xff] %v1094_v43  ;;  %v1096_v44 = vld [vmem:[%s4406_s11 + $0x1560] sm:$0xff] }
  0xbe   : > { %v1098_v45 = vld [vmem:[%s4406_s11 + $0x1580] sm:$0xff]  ;;  %1097 = vst [vmem:[%s4411_s12 + $0x558] sm:$0xff] %v1096_v44 }
  0xbf   : > { %v1100_v46 = vld [vmem:[%s4406_s11 + $0x15a0] sm:$0xff]  ;;  %1099 = vst [vmem:[%s4411_s12 + $0x560] sm:$0xff] %v1098_v45 }
  0xc0   : > { %1101 = vst [vmem:[%s4411_s12 + $0x568] sm:$0xff] %v1100_v46  ;;  %v1102_v47 = vld [vmem:[%s4406_s11 + $0x15c0] sm:$0xff] }
  0xc1   : > { %v1104_v48 = vld [vmem:[%s4406_s11 + $0x15e0] sm:$0xff]  ;;  %1103 = vst [vmem:[%s4411_s12 + $0x570] sm:$0xff] %v1102_v47 }
  0xc2   : > { %v1106_v49 = vld [vmem:[%s4406_s11 + $0x1600] sm:$0xff]  ;;  %1105 = vst [vmem:[%s4411_s12 + $0x578] sm:$0xff] %v1104_v48 }
  0xc3   : > { %1107 = vst [vmem:[%s4411_s12 + $0x580] sm:$0xff] %v1106_v49  ;;  %v1108_v50 = vld [vmem:[%s4406_s11 + $0x1620] sm:$0xff] }
  0xc4   : > { %v1110_v51 = vld [vmem:[%s4406_s11 + $0x1640] sm:$0xff]  ;;  %1109 = vst [vmem:[%s4411_s12 + $0x588] sm:$0xff] %v1108_v50 }
  0xc5   : > { %v1112_v52 = vld [vmem:[%s4406_s11 + $0x1660] sm:$0xff]  ;;  %1111 = vst [vmem:[%s4411_s12 + $0x590] sm:$0xff] %v1110_v51 }
  0xc6   : > { %1113 = vst [vmem:[%s4411_s12 + $0x598] sm:$0xff] %v1112_v52  ;;  %v1114_v53 = vld [vmem:[%s4406_s11 + $0x1680] sm:$0xff] }
  0xc7   : > { %v1116_v54 = vld [vmem:[%s4406_s11 + $0x16a0] sm:$0xff]  ;;  %1115 = vst [vmem:[%s4411_s12 + $0x5a0] sm:$0xff] %v1114_v53 }
  0xc8   : > { %v1118_v55 = vld [vmem:[%s4406_s11 + $0x16c0] sm:$0xff]  ;;  %1117 = vst [vmem:[%s4411_s12 + $0x5a8] sm:$0xff] %v1116_v54 }
  0xc9   : > { %1119 = vst [vmem:[%s4411_s12 + $0x5b0] sm:$0xff] %v1118_v55  ;;  %v1120_v56 = vld [vmem:[%s4406_s11 + $0x16e0] sm:$0xff] }
  0xca   : > { %v1122_v57 = vld [vmem:[%s4406_s11 + $0x1700] sm:$0xff]  ;;  %1121 = vst [vmem:[%s4411_s12 + $0x5b8] sm:$0xff] %v1120_v56 }
  0xcb   : > { %v1124_v58 = vld [vmem:[%s4406_s11 + $0x1720] sm:$0xff]  ;;  %1123 = vst [vmem:[%s4411_s12 + $0x5c0] sm:$0xff] %v1122_v57 }
  0xcc   : > { %1125 = vst [vmem:[%s4411_s12 + $0x5c8] sm:$0xff] %v1124_v58  ;;  %v1126_v59 = vld [vmem:[%s4406_s11 + $0x1740] sm:$0xff] }
  0xcd   : > { %v1128_v60 = vld [vmem:[%s4406_s11 + $0x1760] sm:$0xff]  ;;  %1127 = vst [vmem:[%s4411_s12 + $0x5d0] sm:$0xff] %v1126_v59 }
  0xce   : > { %v1130_v61 = vld [vmem:[%s4406_s11 + $0x1780] sm:$0xff]  ;;  %1129 = vst [vmem:[%s4411_s12 + $0x5d8] sm:$0xff] %v1128_v60 }
  0xcf   : > { %1131 = vst [vmem:[%s4411_s12 + $0x5e0] sm:$0xff] %v1130_v61  ;;  %v1132_v62 = vld [vmem:[%s4406_s11 + $0x17a0] sm:$0xff] }
  0xd0   : > { %v1134_v63 = vld [vmem:[%s4406_s11 + $0x17c0] sm:$0xff]  ;;  %1133 = vst [vmem:[%s4411_s12 + $0x5e8] sm:$0xff] %v1132_v62 }
  0xd1   : > { %v1136_v0 = vld [vmem:[%s4406_s11 + $0x17e0] sm:$0xff]  ;;  %1135 = vst [vmem:[%s4411_s12 + $0x5f0] sm:$0xff] %v1134_v63 }
  0xd2   : > { %1137 = vst [vmem:[%s4411_s12 + $0x5f8] sm:$0xff] %v1136_v0  ;;  %v1138_v1 = vld [vmem:[%s4406_s11 + $0x1800] sm:$0xff] }
  0xd3   : > { %v1140_v2 = vld [vmem:[%s4406_s11 + $0x1820] sm:$0xff]  ;;  %1139 = vst [vmem:[%s4411_s12 + $0x600] sm:$0xff] %v1138_v1 }
  0xd4   : > { %v1142_v3 = vld [vmem:[%s4406_s11 + $0x1840] sm:$0xff]  ;;  %1141 = vst [vmem:[%s4411_s12 + $0x608] sm:$0xff] %v1140_v2 }
  0xd5   : > { %1143 = vst [vmem:[%s4411_s12 + $0x610] sm:$0xff] %v1142_v3  ;;  %v1144_v4 = vld [vmem:[%s4406_s11 + $0x1860] sm:$0xff] }
  0xd6   : > { %v1146_v5 = vld [vmem:[%s4406_s11 + $0x1880] sm:$0xff]  ;;  %1145 = vst [vmem:[%s4411_s12 + $0x618] sm:$0xff] %v1144_v4 }
  0xd7   : > { %v1148_v6 = vld [vmem:[%s4406_s11 + $0x18a0] sm:$0xff]  ;;  %1147 = vst [vmem:[%s4411_s12 + $0x620] sm:$0xff] %v1146_v5 }
  0xd8   : > { %1149 = vst [vmem:[%s4411_s12 + $0x628] sm:$0xff] %v1148_v6  ;;  %v1150_v7 = vld [vmem:[%s4406_s11 + $0x18c0] sm:$0xff] }
  0xd9   : > { %v1152_v8 = vld [vmem:[%s4406_s11 + $0x18e0] sm:$0xff]  ;;  %1151 = vst [vmem:[%s4411_s12 + $0x630] sm:$0xff] %v1150_v7 }
  0xda   : > { %v1154_v9 = vld [vmem:[%s4406_s11 + $0x1900] sm:$0xff]  ;;  %1153 = vst [vmem:[%s4411_s12 + $0x638] sm:$0xff] %v1152_v8 }
  0xdb   : > { %1155 = vst [vmem:[%s4411_s12 + $0x640] sm:$0xff] %v1154_v9  ;;  %v1156_v10 = vld [vmem:[%s4406_s11 + $0x1920] sm:$0xff] }
  0xdc   : > { %v1158_v11 = vld [vmem:[%s4406_s11 + $0x1940] sm:$0xff]  ;;  %1157 = vst [vmem:[%s4411_s12 + $0x648] sm:$0xff] %v1156_v10 }
  0xdd   : > { %v1160_v12 = vld [vmem:[%s4406_s11 + $0x1960] sm:$0xff]  ;;  %1159 = vst [vmem:[%s4411_s12 + $0x650] sm:$0xff] %v1158_v11 }
  0xde   : > { %1161 = vst [vmem:[%s4411_s12 + $0x658] sm:$0xff] %v1160_v12  ;;  %v1162_v13 = vld [vmem:[%s4406_s11 + $0x1980] sm:$0xff] }
  0xdf   : > { %v1164_v14 = vld [vmem:[%s4406_s11 + $0x19a0] sm:$0xff]  ;;  %1163 = vst [vmem:[%s4411_s12 + $0x660] sm:$0xff] %v1162_v13 }
  0xe0   : > { %v1166_v15 = vld [vmem:[%s4406_s11 + $0x19c0] sm:$0xff]  ;;  %1165 = vst [vmem:[%s4411_s12 + $0x668] sm:$0xff] %v1164_v14 }
  0xe1   : > { %1167 = vst [vmem:[%s4411_s12 + $0x670] sm:$0xff] %v1166_v15  ;;  %v1168_v16 = vld [vmem:[%s4406_s11 + $0x19e0] sm:$0xff] }
  0xe2   : > { %v1170_v17 = vld [vmem:[%s4406_s11 + $0x1a00] sm:$0xff]  ;;  %1169 = vst [vmem:[%s4411_s12 + $0x678] sm:$0xff] %v1168_v16 }
  0xe3   : > { %v1172_v18 = vld [vmem:[%s4406_s11 + $0x1a20] sm:$0xff]  ;;  %1171 = vst [vmem:[%s4411_s12 + $0x680] sm:$0xff] %v1170_v17 }
  0xe4   : > { %1173 = vst [vmem:[%s4411_s12 + $0x688] sm:$0xff] %v1172_v18  ;;  %v1174_v19 = vld [vmem:[%s4406_s11 + $0x1a40] sm:$0xff] }
  0xe5   : > { %v1176_v20 = vld [vmem:[%s4406_s11 + $0x1a60] sm:$0xff]  ;;  %1175 = vst [vmem:[%s4411_s12 + $0x690] sm:$0xff] %v1174_v19 }
  0xe6   : > { %v1178_v21 = vld [vmem:[%s4406_s11 + $0x1a80] sm:$0xff]  ;;  %1177 = vst [vmem:[%s4411_s12 + $0x698] sm:$0xff] %v1176_v20 }
  0xe7   : > { %1179 = vst [vmem:[%s4411_s12 + $0x6a0] sm:$0xff] %v1178_v21  ;;  %v1180_v22 = vld [vmem:[%s4406_s11 + $0x1aa0] sm:$0xff] }
  0xe8   : > { %v1182_v23 = vld [vmem:[%s4406_s11 + $0x1ac0] sm:$0xff]  ;;  %1181 = vst [vmem:[%s4411_s12 + $0x6a8] sm:$0xff] %v1180_v22 }
  0xe9   : > { %v1184_v24 = vld [vmem:[%s4406_s11 + $0x1ae0] sm:$0xff]  ;;  %1183 = vst [vmem:[%s4411_s12 + $0x6b0] sm:$0xff] %v1182_v23 }
  0xea   : > { %1185 = vst [vmem:[%s4411_s12 + $0x6b8] sm:$0xff] %v1184_v24  ;;  %v1186_v25 = vld [vmem:[%s4406_s11 + $0x1b00] sm:$0xff] }
  0xeb   : > { %v1188_v26 = vld [vmem:[%s4406_s11 + $0x1b20] sm:$0xff]  ;;  %1187 = vst [vmem:[%s4411_s12 + $0x6c0] sm:$0xff] %v1186_v25 }
  0xec   : > { %v1190_v27 = vld [vmem:[%s4406_s11 + $0x1b40] sm:$0xff]  ;;  %1189 = vst [vmem:[%s4411_s12 + $0x6c8] sm:$0xff] %v1188_v26 }
  0xed   : > { %1191 = vst [vmem:[%s4411_s12 + $0x6d0] sm:$0xff] %v1190_v27  ;;  %v1192_v28 = vld [vmem:[%s4406_s11 + $0x1b60] sm:$0xff] }
  0xee   : > { %v1194_v29 = vld [vmem:[%s4406_s11 + $0x1b80] sm:$0xff]  ;;  %1193 = vst [vmem:[%s4411_s12 + $0x6d8] sm:$0xff] %v1192_v28 }
  0xef   : > { %v1196_v30 = vld [vmem:[%s4406_s11 + $0x1ba0] sm:$0xff]  ;;  %1195 = vst [vmem:[%s4411_s12 + $0x6e0] sm:$0xff] %v1194_v29 }
  0xf0   : > { %1197 = vst [vmem:[%s4411_s12 + $0x6e8] sm:$0xff] %v1196_v30  ;;  %v1198_v31 = vld [vmem:[%s4406_s11 + $0x1bc0] sm:$0xff] }
  0xf1   : > { %v1200_v32 = vld [vmem:[%s4406_s11 + $0x1be0] sm:$0xff]  ;;  %1199 = vst [vmem:[%s4411_s12 + $0x6f0] sm:$0xff] %v1198_v31 }
  0xf2   : > { %v1202_v33 = vld [vmem:[%s4406_s11 + $0x1c00] sm:$0xff]  ;;  %1201 = vst [vmem:[%s4411_s12 + $0x6f8] sm:$0xff] %v1200_v32 }
  0xf3   : > { %1203 = vst [vmem:[%s4411_s12 + $0x700] sm:$0xff] %v1202_v33  ;;  %v1204_v34 = vld [vmem:[%s4406_s11 + $0x1c20] sm:$0xff] }
  0xf4   : > { %v1206_v35 = vld [vmem:[%s4406_s11 + $0x1c40] sm:$0xff]  ;;  %1205 = vst [vmem:[%s4411_s12 + $0x708] sm:$0xff] %v1204_v34 }
  0xf5   : > { %v1208_v36 = vld [vmem:[%s4406_s11 + $0x1c60] sm:$0xff]  ;;  %1207 = vst [vmem:[%s4411_s12 + $0x710] sm:$0xff] %v1206_v35 }
  0xf6   : > { %1209 = vst [vmem:[%s4411_s12 + $0x718] sm:$0xff] %v1208_v36  ;;  %v1210_v37 = vld [vmem:[%s4406_s11 + $0x1c80] sm:$0xff] }
  0xf7   : > { %v1212_v38 = vld [vmem:[%s4406_s11 + $0x1ca0] sm:$0xff]  ;;  %1211 = vst [vmem:[%s4411_s12 + $0x720] sm:$0xff] %v1210_v37 }
  0xf8   : > { %v1214_v39 = vld [vmem:[%s4406_s11 + $0x1cc0] sm:$0xff]  ;;  %1213 = vst [vmem:[%s4411_s12 + $0x728] sm:$0xff] %v1212_v38 }
  0xf9   : > { %1215 = vst [vmem:[%s4411_s12 + $0x730] sm:$0xff] %v1214_v39  ;;  %v1216_v40 = vld [vmem:[%s4406_s11 + $0x1ce0] sm:$0xff] }
  0xfa   : > { %v1218_v41 = vld [vmem:[%s4406_s11 + $0x1d00] sm:$0xff]  ;;  %1217 = vst [vmem:[%s4411_s12 + $0x738] sm:$0xff] %v1216_v40 }
  0xfb   : > { %v1220_v42 = vld [vmem:[%s4406_s11 + $0x1d20] sm:$0xff]  ;;  %1219 = vst [vmem:[%s4411_s12 + $0x740] sm:$0xff] %v1218_v41 }
  0xfc   : > { %1221 = vst [vmem:[%s4411_s12 + $0x748] sm:$0xff] %v1220_v42  ;;  %v1222_v43 = vld [vmem:[%s4406_s11 + $0x1d40] sm:$0xff] }
  0xfd   : > { %v1224_v44 = vld [vmem:[%s4406_s11 + $0x1d60] sm:$0xff]  ;;  %1223 = vst [vmem:[%s4411_s12 + $0x750] sm:$0xff] %v1222_v43 }
  0xfe   : > { %v1226_v45 = vld [vmem:[%s4406_s11 + $0x1d80] sm:$0xff]  ;;  %1225 = vst [vmem:[%s4411_s12 + $0x758] sm:$0xff] %v1224_v44 }
  0xff   : > { %1227 = vst [vmem:[%s4411_s12 + $0x760] sm:$0xff] %v1226_v45  ;;  %v1228_v46 = vld [vmem:[%s4406_s11 + $0x1da0] sm:$0xff] }
 0x100   : > { %v1230_v47 = vld [vmem:[%s4406_s11 + $0x1dc0] sm:$0xff]  ;;  %1229 = vst [vmem:[%s4411_s12 + $0x768] sm:$0xff] %v1228_v46 }
 0x101   : > { %v1232_v48 = vld [vmem:[%s4406_s11 + $0x1de0] sm:$0xff]  ;;  %1231 = vst [vmem:[%s4411_s12 + $0x770] sm:$0xff] %v1230_v47 }
 0x102   : > { %1233 = vst [vmem:[%s4411_s12 + $0x778] sm:$0xff] %v1232_v48  ;;  %v1234_v49 = vld [vmem:[%s4406_s11 + $0x1e00] sm:$0xff] }
 0x103   : > { %v1236_v50 = vld [vmem:[%s4406_s11 + $0x1e20] sm:$0xff]  ;;  %1235 = vst [vmem:[%s4411_s12 + $0x780] sm:$0xff] %v1234_v49 }
 0x104   : > { %v1238_v51 = vld [vmem:[%s4406_s11 + $0x1e40] sm:$0xff]  ;;  %1237 = vst [vmem:[%s4411_s12 + $0x788] sm:$0xff] %v1236_v50 }
 0x105   : > { %1239 = vst [vmem:[%s4411_s12 + $0x790] sm:$0xff] %v1238_v51  ;;  %v1240_v52 = vld [vmem:[%s4406_s11 + $0x1e60] sm:$0xff] }
 0x106   : > { %v1242_v53 = vld [vmem:[%s4406_s11 + $0x1e80] sm:$0xff]  ;;  %1241 = vst [vmem:[%s4411_s12 + $0x798] sm:$0xff] %v1240_v52 }
 0x107   : > { %v1244_v54 = vld [vmem:[%s4406_s11 + $0x1ea0] sm:$0xff]  ;;  %1243 = vst [vmem:[%s4411_s12 + $0x7a0] sm:$0xff] %v1242_v53 }
 0x108   : > { %1245 = vst [vmem:[%s4411_s12 + $0x7a8] sm:$0xff] %v1244_v54  ;;  %v1246_v55 = vld [vmem:[%s4406_s11 + $0x1ec0] sm:$0xff] }
 0x109   : > { %v1248_v56 = vld [vmem:[%s4406_s11 + $0x1ee0] sm:$0xff]  ;;  %1247 = vst [vmem:[%s4411_s12 + $0x7b0] sm:$0xff] %v1246_v55 }
 0x10a   : > { %v1250_v57 = vld [vmem:[%s4406_s11 + $0x1f00] sm:$0xff]  ;;  %1249 = vst [vmem:[%s4411_s12 + $0x7b8] sm:$0xff] %v1248_v56 }
 0x10b   : > { %1251 = vst [vmem:[%s4411_s12 + $0x7c0] sm:$0xff] %v1250_v57  ;;  %v1252_v58 = vld [vmem:[%s4406_s11 + $0x1f20] sm:$0xff] }
 0x10c   : > { %v1254_v59 = vld [vmem:[%s4406_s11 + $0x1f40] sm:$0xff]  ;;  %1253 = vst [vmem:[%s4411_s12 + $0x7c8] sm:$0xff] %v1252_v58 }
 0x10d   : > { %v1256_v60 = vld [vmem:[%s4406_s11 + $0x1f60] sm:$0xff]  ;;  %1255 = vst [vmem:[%s4411_s12 + $0x7d0] sm:$0xff] %v1254_v59 }
 0x10e   : > { %1257 = vst [vmem:[%s4411_s12 + $0x7d8] sm:$0xff] %v1256_v60  ;;  %v1258_v61 = vld [vmem:[%s4406_s11 + $0x1f80] sm:$0xff] }
 0x10f   : > { %v1260_v62 = vld [vmem:[%s4406_s11 + $0x1fa0] sm:$0xff]  ;;  %1259 = vst [vmem:[%s4411_s12 + $0x7e0] sm:$0xff] %v1258_v61 }
 0x110   : > { %v1262_v63 = vld [vmem:[%s4406_s11 + $0x1fc0] sm:$0xff]  ;;  %1261 = vst [vmem:[%s4411_s12 + $0x7e8] sm:$0xff] %v1260_v62 }
 0x111   : > { %1263 = vst [vmem:[%s4411_s12 + $0x7f0] sm:$0xff] %v1262_v63  ;;  %v1264_v0 = vld [vmem:[%s4406_s11 + $0x1fe0] sm:$0xff] }
 0x112   : > { %1265 = vst [vmem:[%s4411_s12 + $0x7f8] sm:$0xff] %v1264_v0 }
 0x113 PF: > { %p3559_p5 = scmp.ge.s32.totalorder %s4329_s25, 1  ;;  %p1295_p6 = scmp.lt.s32.totalorder %s4329_s25, 5 }
 0x115   : > { %p1296_p7 = pnand %p3559_p5, %p1295_p6 }
 0x116   : > { %s1302_s13 = sand.u32 (!%p1296_p7), 1, %s4321_s23   ;;  %s3561_s14 = sshll.u32 (!%p1296_p7), %s4386_s5, 1 }
 0x117   : > { %1299 = sbr.rel (%p1296_p7) target bundleno = 1005 (0x3ed), region = 78  ;;  %s3560_s15 = sshll.u32 (!%p1296_p7), %s1302_s13, 11 }
 0x118   : > { %p1341_p8 = scmp.lt.s32.totalorder (!%p1296_p7), %s3561_s14, 7  ;;  %s3563_s16 = sshll.u32 (!%p1296_p7), %s4386_s5, 5 }
 0x119   : > { %p1351_p9 = scmp.lt.s32.totalorder (!%p1296_p7), %s3563_s16, 127  ;;  %s4942_s30 = scalar_lea.vmem (!%p1296_p7), [#allocation4], %s3560_s15 }
 0x11a   : > { %p3565_p10 = scmp.ne.s32.totalorder (!%p1296_p7), %s4386_s5, 0 }
 0x11c   : > { %s5334_s14 = smov (!%p1341_p8, %s3561_s14), 7  ;;  %s5336_s16 = smov (!%p1351_p9, %s3563_s16), 127 }
 0x11d   : > { %s1343_s19 = scalar_lea.vmem %s5325_s2, %s5334_s14  ;;  %s1348_s22 = scalar_lea.vmem %s5326_s3, %s5334_s14 }
 0x11e   : > { %s3564_s25 = sshll.u32 %s5336_s16, 3  ;;  %1359 = sbr.rel (%p3565_p10) target bundleno = 293 (0x125), region = 86 }
 0x11f   : > { %s4940_s28 = scalar_lea.vmem %s5327_s4, %s3564_s25 }
 0x123   : > { %vm1360_vm0 = vcmask 7168   ;;  %v4331_v1 = vmov 0.0  }
 0x124   : > { %1361 = vst.msk [vmem:[#allocation2] sm:$0xff] %vm1360_vm0, %v4331_v1 }
 0x125 PF: > { %v3903_v2 = vld [vmem:[%s4942_s30 + $0x74] ss:$8 sps:$4 sm:$0xff]   ;;  %v3907_v4 = vld [vmem:[%s4942_s30 + $0x70] ss:$8 sps:$4 sm:$0xff]   ;;  %v3909_v6 = vld [vmem:[%s4942_s30 + $0x64] ss:$8 sps:$4 sm:$0xff]  }
 0x126   : > { %v3905_v3 = vld [vmem:[%s4942_s30 + $0x174] ss:$8 sps:$4 sm:$0xff]   ;;  %2962 = vmatprep.subr.bf16.mxu0 %v3903_v2  ;;  %v3908_v5 = vld [vmem:[%s4942_s30 + $0x170] ss:$8 sps:$4 sm:$0xff]   ;;  %v3911_v7 = vld [vmem:[%s4942_s30 + $0x164] ss:$8 sps:$4 sm:$0xff]  }
 0x127   : > { %3003 = vmatprep.subr.bf16.mxu1 %v3905_v3  ;;  %2963 = vmatpush1.bf16.msra.mxu0 %v3907_v4  ;;  %v3913_v8 = vld [vmem:[%s4942_s30 + $0x60] ss:$8 sps:$4 sm:$0xff]   ;;  %v3915_v10 = vld [vmem:[%s4942_s30 + $0x54] ss:$8 sps:$4 sm:$0xff]   ;;  %v3919_v12 = vld [vmem:[%s4942_s30 + $0x50] ss:$8 sps:$4 sm:$0xff]  }
 0x128   : > { %3004 = vmatpush1.bf16.msra.mxu1 %v3908_v5  ;;  %2964 = vmatprep.subr.bf16.mxu0 %v3909_v6  ;;  %v3914_v9 = vld [vmem:[%s4942_s30 + $0x160] ss:$8 sps:$4 sm:$0xff]   ;;  %v3917_v11 = vld [vmem:[%s4942_s30 + $0x154] ss:$8 sps:$4 sm:$0xff]   ;;  %v3920_v13 = vld [vmem:[%s4942_s30 + $0x150] ss:$8 sps:$4 sm:$0xff]  }
 0x129   : > { %3005 = vmatprep.subr.bf16.mxu1 %v3911_v7  ;;  %v3921_v14 = vld [vmem:[%s4942_s30 + $0x44] ss:$8 sps:$4 sm:$0xff]   ;;  %v3925_v16 = vld [vmem:[%s4942_s30 + $0x40] ss:$8 sps:$4 sm:$0xff]   ;;  %v3927_v18 = vld [vmem:[%s4942_s30 + $0x34] ss:$8 sps:$4 sm:$0xff]  }
 0x12a   : > { %v3923_v15 = vld [vmem:[%s4942_s30 + $0x144] ss:$8 sps:$4 sm:$0xff]   ;;  %v3926_v17 = vld [vmem:[%s4942_s30 + $0x140] ss:$8 sps:$4 sm:$0xff]   ;;  %v3929_v19 = vld [vmem:[%s4942_s30 + $0x134] ss:$8 sps:$4 sm:$0xff]  }
 0x12b   : > { %2965 = vmatpush1.bf16.msra.mxu0 %v3913_v8  ;;  %v3931_v20 = vld [vmem:[%s4942_s30 + $0x30] ss:$8 sps:$4 sm:$0xff]   ;;  %v3933_v22 = vld [vmem:[%s4942_s30 + $0x24] ss:$8 sps:$4 sm:$0xff]   ;;  %v3937_v24 = vld [vmem:[%s4942_s30 + $0x20] ss:$8 sps:$4 sm:$0xff]  }
 0x12c   : > { %3006 = vmatpush1.bf16.msra.mxu1 %v3914_v9  ;;  %2966 = vmatprep.subr.bf16.mxu0 %v3915_v10  ;;  %v3932_v21 = vld [vmem:[%s4942_s30 + $0x130] ss:$8 sps:$4 sm:$0xff]   ;;  %v3935_v23 = vld [vmem:[%s4942_s30 + $0x124] ss:$8 sps:$4 sm:$0xff]   ;;  %v3938_v25 = vld [vmem:[%s4942_s30 + $0x120] ss:$8 sps:$4 sm:$0xff]  }
 0x12d   : > { %3007 = vmatprep.subr.bf16.mxu1 %v3917_v11  ;;  %v3939_v26 = vld [vmem:[%s4942_s30 + $0x14] ss:$8 sps:$4 sm:$0xff]   ;;  %v3943_v28 = vld [vmem:[%s4942_s30 + $0x10] ss:$8 sps:$4 sm:$0xff]   ;;  %v3945_v30 = vld [vmem:[%s4942_s30 + $0x4] ss:$8 sps:$4 sm:$0xff]  }
 0x12e   : > { %v3941_v27 = vld [vmem:[%s4942_s30 + $0x114] ss:$8 sps:$4 sm:$0xff]   ;;  %v3944_v29 = vld [vmem:[%s4942_s30 + $0x110] ss:$8 sps:$4 sm:$0xff]   ;;  %v3947_v31 = vld [vmem:[%s4942_s30 + $0x104] ss:$8 sps:$4 sm:$0xff]  }
 0x12f   : > { %2967 = vmatpush1.bf16.msra.mxu0 %v3919_v12  ;;  %v3949_v32 = vld [vmem:[%s4942_s30] ss:$8 sps:$4 sm:$0xff]   ;;  %v3951_v34 = vld [vmem:[%s4942_s30 + $0xf4] ss:$8 sps:$4 sm:$0xff]   ;;  %v3955_v36 = vld [vmem:[%s4942_s30 + $0xf0] ss:$8 sps:$4 sm:$0xff]  }
 0x130   : > { %3008 = vmatpush1.bf16.msra.mxu1 %v3920_v13  ;;  %2968 = vmatprep.subr.bf16.mxu0 %v3921_v14  ;;  %v3950_v33 = vld [vmem:[%s4942_s30 + $0x100] ss:$8 sps:$4 sm:$0xff]   ;;  %v3953_v35 = vld [vmem:[%s4942_s30 + $0x1f4] ss:$8 sps:$4 sm:$0xff]   ;;  %v3956_v37 = vld [vmem:[%s4942_s30 + $0x1f0] ss:$8 sps:$4 sm:$0xff]  }
 0x131   : > { %3009 = vmatprep.subr.bf16.mxu1 %v3923_v15  ;;  %v3957_v38 = vld [vmem:[%s4942_s30 + $0xe4] ss:$8 sps:$4 sm:$0xff]   ;;  %v3961_v40 = vld [vmem:[%s4942_s30 + $0xe0] ss:$8 sps:$4 sm:$0xff]   ;;  %v3963_v42 = vld [vmem:[%s4942_s30 + $0xd4] ss:$8 sps:$4 sm:$0xff]  }
 0x132   : > { %v3959_v39 = vld [vmem:[%s4942_s30 + $0x1e4] ss:$8 sps:$4 sm:$0xff]   ;;  %v3962_v41 = vld [vmem:[%s4942_s30 + $0x1e0] ss:$8 sps:$4 sm:$0xff]   ;;  %v3965_v43 = vld [vmem:[%s4942_s30 + $0x1d4] ss:$8 sps:$4 sm:$0xff]  }
 0x133   : > { %2969 = vmatpush1.bf16.msra.mxu0 %v3925_v16  ;;  %v3967_v44 = vld [vmem:[%s4942_s30 + $0xd0] ss:$8 sps:$4 sm:$0xff]   ;;  %v3969_v46 = vld [vmem:[%s4942_s30 + $0xc4] ss:$8 sps:$4 sm:$0xff]   ;;  %v3973_v51 = vld [vmem:[%s4942_s30 + $0xc0] ss:$8 sps:$4 sm:$0xff]  }
 0x134   : > { %3010 = vmatpush1.bf16.msra.mxu1 %v3926_v17  ;;  %2970 = vmatprep.subr.bf16.mxu0 %v3927_v18  ;;  %v3968_v45 = vld [vmem:[%s4942_s30 + $0x1d0] ss:$8 sps:$4 sm:$0xff]   ;;  %v3971_v47 = vld [vmem:[%s4942_s30 + $0x1c4] ss:$8 sps:$4 sm:$0xff]   ;;  %v3974_v52 = vld [vmem:[%s4942_s30 + $0x1c0] ss:$8 sps:$4 sm:$0xff]  }
 0x135   : > { %3011 = vmatprep.subr.bf16.mxu1 %v3929_v19  ;;  %v1362_v48 = vld [vmem:[%s5323_s0] sm:$0xff]  ;;  %v1363_v50 = vld [vmem:[%s5323_s0 + $0x8] sm:$0xff]  ;;  %vm3473_vm3 = vcmask 7168   ;;  %p3838_p11 = scmp.ne.s32.totalorder %s4386_s5, 3 }
 0x136   : > { %v3567_v49 = vcombine.high %v1362_v48, %v1362_v48  ;;  %v3569_v53 = vcombine.high %v1363_v50, %v1363_v50  ;;  %v3975_v54 = vld [vmem:[%s4942_s30 + $0xb4] ss:$8 sps:$4 sm:$0xff]   ;;  %v3979_v56 = vld [vmem:[%s4942_s30 + $0xb0] ss:$8 sps:$4 sm:$0xff]   ;;  %v3981_v58 = vld [vmem:[%s4942_s30 + $0xa4] ss:$8 sps:$4 sm:$0xff]   ;;  %v3566_v8 = vcombine.low %v1362_v48, %v1362_v48  ;;  %v3568_v9 = vcombine.low %v1363_v50, %v1363_v50 }
 0x137   : > { %2971 = vmatpush1.bf16.msra.mxu0 %v3931_v20  ;;  %v3977_v55 = vld [vmem:[%s4942_s30 + $0x1b4] ss:$8 sps:$4 sm:$0xff]   ;;  %v3980_v57 = vld [vmem:[%s4942_s30 + $0x1b0] ss:$8 sps:$4 sm:$0xff]   ;;  %v3983_v59 = vld [vmem:[%s4942_s30 + $0x1a4] ss:$8 sps:$4 sm:$0xff]  }
 0x138   : > { %3012 = vmatpush1.bf16.msra.mxu1 %v3932_v21  ;;  %2972 = vmatprep.subr.bf16.mxu0 %v3933_v22  ;;  %v3985_v60 = vld [vmem:[%s4942_s30 + $0xa0] ss:$8 sps:$4 sm:$0xff]   ;;  %v3987_v62 = vld [vmem:[%s4942_s30 + $0x94] ss:$8 sps:$4 sm:$0xff]   ;;  %v3991_v0 = vld [vmem:[%s4942_s30 + $0x90] ss:$8 sps:$4 sm:$0xff]  }
 0x139   : > { %3013 = vmatprep.subr.bf16.mxu1 %v3935_v23  ;;  %2994 = vmatprep.mubr.bf16.mxu0 %v3567_v49  ;;  %v3986_v61 = vld [vmem:[%s4942_s30 + $0x1a0] ss:$8 sps:$4 sm:$0xff]   ;;  %v3989_v63 = vld [vmem:[%s4942_s30 + $0x194] ss:$8 sps:$4 sm:$0xff]   ;;  %v3992_v1 = vld [vmem:[%s4942_s30 + $0x190] ss:$8 sps:$4 sm:$0xff]  }
 0x13a   : > { %3035 = vmatprep.mubr.bf16.mxu1 %v3569_v53  ;;  %v3993_v2 = vld [vmem:[%s4942_s30 + $0x84] ss:$8 sps:$4 sm:$0xff]   ;;  %v3997_v4 = vld [vmem:[%s4942_s30 + $0x80] ss:$8 sps:$4 sm:$0xff]   ;;  %v4005_v6 = vld [vmem:[%s4942_s30 + $0x274] ss:$8 sps:$4 sm:$0xff]  }
 0x13b   : > { %2973 = vmatpush1.bf16.msra.mxu0 %v3937_v24  ;;  %v3995_v3 = vld [vmem:[%s4942_s30 + $0x184] ss:$8 sps:$4 sm:$0xff]   ;;  %v3998_v5 = vld [vmem:[%s4942_s30 + $0x180] ss:$8 sps:$4 sm:$0xff]   ;;  %v4008_v7 = vld [vmem:[%s4942_s30 + $0x374] ss:$8 sps:$4 sm:$0xff]  }
 0x13c   : > { %3014 = vmatpush1.bf16.msra.mxu1 %v3938_v25  ;;  %2974 = vmatprep.subr.bf16.mxu0 %v3939_v26  ;;  %v4003_v10 = vld [vmem:[%s4942_s30 + $0x270] ss:$8 sps:$4 sm:$0xff]   ;;  %v4011_v12 = vld [vmem:[%s4942_s30 + $0x264] ss:$8 sps:$4 sm:$0xff]   ;;  %v4009_v14 = vld [vmem:[%s4942_s30 + $0x260] ss:$8 sps:$4 sm:$0xff]  }
 0x13d   : > { %3015 = vmatprep.subr.bf16.mxu1 %v3941_v27  ;;  %v4006_v11 = vld [vmem:[%s4942_s30 + $0x370] ss:$8 sps:$4 sm:$0xff]   ;;  %v4014_v13 = vld [vmem:[%s4942_s30 + $0x364] ss:$8 sps:$4 sm:$0xff]   ;;  %v4012_v15 = vld [vmem:[%s4942_s30 + $0x360] ss:$8 sps:$4 sm:$0xff]  }
 0x13e   : > { %v4017_v16 = vld [vmem:[%s4942_s30 + $0x254] ss:$8 sps:$4 sm:$0xff]   ;;  %v4015_v18 = vld [vmem:[%s4942_s30 + $0x250] ss:$8 sps:$4 sm:$0xff]   ;;  %v4023_v20 = vld [vmem:[%s4942_s30 + $0x244] ss:$8 sps:$4 sm:$0xff]  }
 0x13f   : > { %2975 = vmatpush1.bf16.msra.mxu0 %v3943_v28  ;;  %v4020_v17 = vld [vmem:[%s4942_s30 + $0x354] ss:$8 sps:$4 sm:$0xff]   ;;  %v4018_v19 = vld [vmem:[%s4942_s30 + $0x350] ss:$8 sps:$4 sm:$0xff]   ;;  %v4026_v21 = vld [vmem:[%s4942_s30 + $0x344] ss:$8 sps:$4 sm:$0xff]  }
 0x140   : > { %3016 = vmatpush1.bf16.msra.mxu1 %v3944_v29  ;;  %2976 = vmatprep.subr.bf16.mxu0 %v3945_v30  ;;  %v4021_v22 = vld [vmem:[%s4942_s30 + $0x240] ss:$8 sps:$4 sm:$0xff]   ;;  %v4029_v24 = vld [vmem:[%s4942_s30 + $0x234] ss:$8 sps:$4 sm:$0xff]   ;;  %v4027_v26 = vld [vmem:[%s4942_s30 + $0x230] ss:$8 sps:$4 sm:$0xff]  }
 0x141   : > { %3017 = vmatprep.subr.bf16.mxu1 %v3947_v31  ;;  %v4024_v23 = vld [vmem:[%s4942_s30 + $0x340] ss:$8 sps:$4 sm:$0xff]   ;;  %v4032_v25 = vld [vmem:[%s4942_s30 + $0x334] ss:$8 sps:$4 sm:$0xff]   ;;  %v4030_v27 = vld [vmem:[%s4942_s30 + $0x330] ss:$8 sps:$4 sm:$0xff]  }
 0x142   : > { %v4035_v28 = vld [vmem:[%s4942_s30 + $0x224] ss:$8 sps:$4 sm:$0xff]   ;;  %v4033_v30 = vld [vmem:[%s4942_s30 + $0x220] ss:$8 sps:$4 sm:$0xff]   ;;  %v4068_v53 = vld [vmem:[%s4942_s30 + $0x3d4] ss:$8 sps:$4 sm:$0xff]  }
 0x143   : > { %2977 = vmatpush1.bf16.msra.mxu0 %v3949_v32  ;;  %v4038_v29 = vld [vmem:[%s4942_s30 + $0x324] ss:$8 sps:$4 sm:$0xff]   ;;  %v4036_v31 = vld [vmem:[%s4942_s30 + $0x320] ss:$8 sps:$4 sm:$0xff]   ;;  %v4041_v32 = vld [vmem:[%s4942_s30 + $0x214] ss:$8 sps:$4 sm:$0xff]  }
 0x144   : > { %3018 = vmatpush1.bf16.msra.mxu1 %v3950_v33  ;;  %2978 = vmatprep.subr.bf16.mxu0 %v3951_v34  ;;  %v4044_v33 = vld [vmem:[%s4942_s30 + $0x314] ss:$8 sps:$4 sm:$0xff]   ;;  %v5044_v34 = vld [vmem:[%s5323_s0 + $0x10] sm:$0xff] }
 0x145   : > { %3019 = vmatprep.subr.bf16.mxu1 %v3953_v35  ;;  %v5049_v35 = vld [vmem:[%s5323_s0 + $0x18] sm:$0xff]  ;;  %v4057_v50 = vld [vmem:[%s4942_s30 + $0x2e0] ss:$8 sps:$4 sm:$0xff]  }
 0x146   : > { %v4059_v48 = vld [vmem:[%s4942_s30 + $0x2e4] ss:$8 sps:$4 sm:$0xff]  }
 0x147   : > { %2979 = vmatpush2.bf16.msra.mxu0 %v3955_v36  ;;  %v4039_v36 = vld [vmem:[%s4942_s30 + $0x210] ss:$8 sps:$4 sm:$0xff]   ;;  %v4062_v49 = vld [vmem:[%s4942_s30 + $0x3e4] ss:$8 sps:$4 sm:$0xff]  }
 0x148   : > { %3020 = vmatpush2.bf16.msra.mxu1 %v3956_v37  ;;  %2980 = vmatprep.subr.bf16.mxu0 %v3957_v38  ;;  %v4042_v37 = vld [vmem:[%s4942_s30 + $0x310] ss:$8 sps:$4 sm:$0xff]   ;;  %v3571_v38 = vcombine.high %v5044_v34, %v5044_v34 }
 0x149   : > { %3021 = vmatprep.subr.bf16.mxu1 %v3959_v39  ;;  %v3573_v39 = vcombine.high %v5049_v35, %v5049_v35 }
 0x14b   : > { %2981 = vmatpush2.bf16.msra.mxu0 %v3961_v40  ;;  %v4047_v40 = vld [vmem:[%s4942_s30 + $0x204] ss:$8 sps:$4 sm:$0xff]  }
 0x14c   : > { %3022 = vmatpush2.bf16.msra.mxu1 %v3962_v41  ;;  %2982 = vmatprep.subr.bf16.mxu0 %v3963_v42  ;;  %v4050_v41 = vld [vmem:[%s4942_s30 + $0x304] ss:$8 sps:$4 sm:$0xff]   ;;  %v4045_v42 = vld [vmem:[%s4942_s30 + $0x200] ss:$8 sps:$4 sm:$0xff]  }
 0x14d   : > { %3023 = vmatprep.subr.bf16.mxu1 %v3965_v43  ;;  %v4048_v43 = vld [vmem:[%s4942_s30 + $0x300] ss:$8 sps:$4 sm:$0xff]  }
 0x14f   : > { %2983 = vmatpush2.bf16.msra.mxu0 %v3967_v44  ;;  %v4053_v44 = vld [vmem:[%s4942_s30 + $0x2f4] ss:$8 sps:$4 sm:$0xff]  }
 0x150   : > { %3024 = vmatpush2.bf16.msra.mxu1 %v3968_v45  ;;  %2984 = vmatprep.subr.bf16.mxu0 %v3969_v46  ;;  %v4056_v45 = vld [vmem:[%s4942_s30 + $0x3f4] ss:$8 sps:$4 sm:$0xff]   ;;  %v4051_v46 = vld [vmem:[%s4942_s30 + $0x2f0] ss:$8 sps:$4 sm:$0xff]  }
 0x151   : > { %3025 = vmatprep.subr.bf16.mxu1 %v3971_v47  ;;  %v4054_v47 = vld [vmem:[%s4942_s30 + $0x3f0] ss:$8 sps:$4 sm:$0xff]  }
 0x153   : > { %2985 = vmatpush2.bf16.msra.mxu0 %v3973_v51  ;;  %v4060_v51 = vld [vmem:[%s4942_s30 + $0x3e0] ss:$8 sps:$4 sm:$0xff]  }
 0x154   : > { %3026 = vmatpush2.bf16.msra.mxu1 %v3974_v52  ;;  %2986 = vmatprep.subr.bf16.mxu0 %v3975_v54  ;;  %v4065_v52 = vld [vmem:[%s4942_s30 + $0x2d4] ss:$8 sps:$4 sm:$0xff]   ;;  %v4063_v54 = vld [vmem:[%s4942_s30 + $0x2d0] ss:$8 sps:$4 sm:$0xff]  }
 0x155   : > { %3027 = vmatprep.subr.bf16.mxu1 %v3977_v55  ;;  %v4066_v55 = vld [vmem:[%s4942_s30 + $0x3d0] ss:$8 sps:$4 sm:$0xff]  }
 0x157   : > { %2987 = vmatpush2.bf16.msra.mxu0 %v3979_v56  ;;  %v4071_v56 = vld [vmem:[%s4942_s30 + $0x2c4] ss:$8 sps:$4 sm:$0xff]  }
 0x158   : > { %3028 = vmatpush2.bf16.msra.mxu1 %v3980_v57  ;;  %2988 = vmatprep.subr.bf16.mxu0 %v3981_v58  ;;  %v4074_v57 = vld [vmem:[%s4942_s30 + $0x3c4] ss:$8 sps:$4 sm:$0xff]   ;;  %v4069_v58 = vld [vmem:[%s4942_s30 + $0x2c0] ss:$8 sps:$4 sm:$0xff]  }
 0x159   : > { %3029 = vmatprep.subr.bf16.mxu1 %v3983_v59  ;;  %v4072_v59 = vld [vmem:[%s4942_s30 + $0x3c0] ss:$8 sps:$4 sm:$0xff]  }
 0x15b   : > { %2989 = vmatpush2.bf16.msra.mxu0 %v3985_v60  ;;  %v4077_v60 = vld [vmem:[%s4942_s30 + $0x2b4] ss:$8 sps:$4 sm:$0xff]  }
 0x15c   : > { %3030 = vmatpush2.bf16.msra.mxu1 %v3986_v61  ;;  %2990 = vmatprep.subr.bf16.mxu0 %v3987_v62  ;;  %v4080_v61 = vld [vmem:[%s4942_s30 + $0x3b4] ss:$8 sps:$4 sm:$0xff]   ;;  %v4075_v62 = vld [vmem:[%s4942_s30 + $0x2b0] ss:$8 sps:$4 sm:$0xff]  }
 0x15d   : > { %3031 = vmatprep.subr.bf16.mxu1 %v3989_v63  ;;  %v4078_v63 = vld [vmem:[%s4942_s30 + $0x3b0] ss:$8 sps:$4 sm:$0xff]  }
 0x15f   : > { %2991 = vmatpush2.bf16.msra.mxu0 %v3991_v0  ;;  %v4083_v0 = vld [vmem:[%s4942_s30 + $0x2a4] ss:$8 sps:$4 sm:$0xff]  }
 0x160   : > { %3032 = vmatpush2.bf16.msra.mxu1 %v3992_v1  ;;  %2992 = vmatprep.subr.bf16.mxu0 %v3993_v2  ;;  %v4086_v1 = vld [vmem:[%s4942_s30 + $0x3a4] ss:$8 sps:$4 sm:$0xff]   ;;  %v4081_v2 = vld [vmem:[%s4942_s30 + $0x2a0] ss:$8 sps:$4 sm:$0xff]  }
 0x161   : > { %3033 = vmatprep.subr.bf16.mxu1 %v3995_v3  ;;  %v4084_v3 = vld [vmem:[%s4942_s30 + $0x3a0] ss:$8 sps:$4 sm:$0xff]  }
 0x163   : > { %2993 = vmatpush2.bf16.msra.mxu0 %v3997_v4  ;;  %v4089_v4 = vld [vmem:[%s4942_s30 + $0x294] ss:$8 sps:$4 sm:$0xff]  }
 0x164   : > { %3034 = vmatpush2.bf16.msra.mxu1 %v3998_v5  ;;  %3044 = vmatprep.subr.bf16.mxu0 %v4005_v6  ;;  %v4092_v5 = vld [vmem:[%s4942_s30 + $0x394] ss:$8 sps:$4 sm:$0xff]   ;;  %v4087_v6 = vld [vmem:[%s4942_s30 + $0x290] ss:$8 sps:$4 sm:$0xff]  }
 0x165   : > { %3085 = vmatprep.subr.bf16.mxu1 %v4008_v7  ;;  %v4090_v7 = vld [vmem:[%s4942_s30 + $0x390] ss:$8 sps:$4 sm:$0xff]  }
 0x166   : > { %2995 = vmatmul.mubr.bf16.vlgmr.msra.gmra.mxu0 %v3566_v8  ;;  %v4095_v8 = vld [vmem:[%s4942_s30 + $0x284] ss:$8 sps:$4 sm:$0xff]  }
 0x167   : > { %3036 = vmatmul.mubr.bf16.vlgmr.msra.gmra.mxu1 %v3568_v9  ;;  %3045 = vmatpush1.bf16.msra.mxu0 %v4003_v10  ;;  %v4098_v9 = vld [vmem:[%s4942_s30 + $0x384] ss:$8 sps:$4 sm:$0xff]   ;;  %v4093_v10 = vld [vmem:[%s4942_s30 + $0x280] ss:$8 sps:$4 sm:$0xff]  }
 0x168   : > { %3086 = vmatpush1.bf16.msra.mxu1 %v4006_v11  ;;  %3046 = vmatprep.subr.bf16.mxu0 %v4011_v12  ;;  %v4096_v11 = vld [vmem:[%s4942_s30 + $0x380] ss:$8 sps:$4 sm:$0xff]   ;;  %v4105_v12 = vld [vmem:[%s4942_s30 + $0x474] ss:$8 sps:$4 sm:$0xff]  }
 0x169   : > { %3087 = vmatprep.subr.bf16.mxu1 %v4014_v13  ;;  %3076 = vmatprep.mubr.bf16.mxu0 %v3571_v38  ;;  %v4108_v13 = vld [vmem:[%s4942_s30 + $0x574] ss:$8 sps:$4 sm:$0xff]   ;;  %v4135_v38 = vld [vmem:[%s4942_s30 + $0x424] ss:$8 sps:$4 sm:$0xff]  }
 0x16a   : > { %3117 = vmatprep.mubr.bf16.mxu1 %v3573_v39  ;;  %v4138_v39 = vld [vmem:[%s4942_s30 + $0x524] ss:$8 sps:$4 sm:$0xff]  }
 0x16b   : > { %3047 = vmatpush1.bf16.msra.mxu0 %v4009_v14  ;;  %v3570_v14 = vcombine.low %v5044_v34, %v5044_v34  ;;  %v4129_v34 = vld [vmem:[%s4942_s30 + $0x434] ss:$8 sps:$4 sm:$0xff]  }
 0x16c   : > { %3088 = vmatpush1.bf16.msra.mxu1 %v4012_v15  ;;  %3048 = vmatprep.subr.bf16.mxu0 %v4017_v16  ;;  %v3572_v15 = vcombine.low %v5049_v35, %v5049_v35  ;;  %v4103_v16 = vld [vmem:[%s4942_s30 + $0x470] ss:$8 sps:$4 sm:$0xff]   ;;  %v4132_v35 = vld [vmem:[%s4942_s30 + $0x534] ss:$8 sps:$4 sm:$0xff]  }
 0x16d   : > { %3089 = vmatprep.subr.bf16.mxu1 %v4020_v17  ;;  %v4106_v17 = vld [vmem:[%s4942_s30 + $0x570] ss:$8 sps:$4 sm:$0xff]  }
 0x16f   : > { %3049 = vmatpush1.bf16.msra.mxu0 %v4015_v18  ;;  %v4111_v18 = vld [vmem:[%s4942_s30 + $0x464] ss:$8 sps:$4 sm:$0xff]  }
 0x170   : > { %3090 = vmatpush1.bf16.msra.mxu1 %v4018_v19  ;;  %3050 = vmatprep.subr.bf16.mxu0 %v4023_v20  ;;  %v4114_v19 = vld [vmem:[%s4942_s30 + $0x564] ss:$8 sps:$4 sm:$0xff]   ;;  %v5106_v20 = vld [vmem:[%s5323_s0 + $0x20] sm:$0xff] }
 0x171   : > { %3091 = vmatprep.subr.bf16.mxu1 %v4026_v21  ;;  %v5111_v21 = vld [vmem:[%s5323_s0 + $0x28] sm:$0xff] }
 0x173   : > { %3051 = vmatpush1.bf16.msra.mxu0 %v4021_v22  ;;  %v3575_v22 = vcombine.high %v5106_v20, %v5106_v20 }
 0x174   : > { %3092 = vmatpush1.bf16.msra.mxu1 %v4024_v23  ;;  %3052 = vmatprep.subr.bf16.mxu0 %v4029_v24  ;;  %v3577_v23 = vcombine.high %v5111_v21, %v5111_v21  ;;  %v4109_v24 = vld [vmem:[%s4942_s30 + $0x460] ss:$8 sps:$4 sm:$0xff]  }
 0x175   : > { %3093 = vmatprep.subr.bf16.mxu1 %v4032_v25  ;;  %v4112_v25 = vld [vmem:[%s4942_s30 + $0x560] ss:$8 sps:$4 sm:$0xff]  }
 0x177   : > { %3053 = vmatpush1.bf16.msra.mxu0 %v4027_v26  ;;  %v4117_v26 = vld [vmem:[%s4942_s30 + $0x454] ss:$8 sps:$4 sm:$0xff]  }
 0x178   : > { %3094 = vmatpush1.bf16.msra.mxu1 %v4030_v27  ;;  %3054 = vmatprep.subr.bf16.mxu0 %v4035_v28  ;;  %v4120_v27 = vld [vmem:[%s4942_s30 + $0x554] ss:$8 sps:$4 sm:$0xff]   ;;  %v4115_v28 = vld [vmem:[%s4942_s30 + $0x450] ss:$8 sps:$4 sm:$0xff]  }
 0x179   : > { %3095 = vmatprep.subr.bf16.mxu1 %v4038_v29  ;;  %v4118_v29 = vld [vmem:[%s4942_s30 + $0x550] ss:$8 sps:$4 sm:$0xff]  }
 0x17b   : > { %3055 = vmatpush1.bf16.msra.mxu0 %v4033_v30  ;;  %v4123_v30 = vld [vmem:[%s4942_s30 + $0x444] ss:$8 sps:$4 sm:$0xff]  }
 0x17c   : > { %3096 = vmatpush1.bf16.msra.mxu1 %v4036_v31  ;;  %3056 = vmatprep.subr.bf16.mxu0 %v4041_v32  ;;  %v4126_v31 = vld [vmem:[%s4942_s30 + $0x544] ss:$8 sps:$4 sm:$0xff]   ;;  %v4121_v32 = vld [vmem:[%s4942_s30 + $0x440] ss:$8 sps:$4 sm:$0xff]  }
 0x17d   : > { %3097 = vmatprep.subr.bf16.mxu1 %v4044_v33  ;;  %v4124_v33 = vld [vmem:[%s4942_s30 + $0x540] ss:$8 sps:$4 sm:$0xff]  }
 0x17f   : > { %3057 = vmatpush1.bf16.msra.mxu0 %v4039_v36  ;;  %v4127_v36 = vld [vmem:[%s4942_s30 + $0x430] ss:$8 sps:$4 sm:$0xff]  }
 0x180   : > { %3098 = vmatpush1.bf16.msra.mxu1 %v4042_v37  ;;  %3058 = vmatprep.subr.bf16.mxu0 %v4047_v40  ;;  %v4130_v37 = vld [vmem:[%s4942_s30 + $0x530] ss:$8 sps:$4 sm:$0xff]   ;;  %v4133_v40 = vld [vmem:[%s4942_s30 + $0x420] ss:$8 sps:$4 sm:$0xff]  }
 0x181   : > { %3099 = vmatprep.subr.bf16.mxu1 %v4050_v41  ;;  %v4136_v41 = vld [vmem:[%s4942_s30 + $0x520] ss:$8 sps:$4 sm:$0xff]  }
 0x183   : > { %3059 = vmatpush1.bf16.msra.mxu0 %v4045_v42  ;;  %v4141_v42 = vld [vmem:[%s4942_s30 + $0x414] ss:$8 sps:$4 sm:$0xff]  }
 0x184   : > { %3100 = vmatpush1.bf16.msra.mxu1 %v4048_v43  ;;  %3060 = vmatprep.subr.bf16.mxu0 %v4053_v44  ;;  %v4144_v43 = vld [vmem:[%s4942_s30 + $0x514] ss:$8 sps:$4 sm:$0xff]   ;;  %v4139_v44 = vld [vmem:[%s4942_s30 + $0x410] ss:$8 sps:$4 sm:$0xff]  }
 0x185   : > { %3101 = vmatprep.subr.bf16.mxu1 %v4056_v45  ;;  %v4142_v45 = vld [vmem:[%s4942_s30 + $0x510] ss:$8 sps:$4 sm:$0xff]  }
 0x187   : > { %3061 = vmatpush2.bf16.msra.mxu0 %v4051_v46  ;;  %v4147_v46 = vld [vmem:[%s4942_s30 + $0x404] ss:$8 sps:$4 sm:$0xff]  }
 0x188   : > { %3102 = vmatpush2.bf16.msra.mxu1 %v4054_v47  ;;  %3062 = vmatprep.subr.bf16.mxu0 %v4059_v48  ;;  %v4150_v47 = vld [vmem:[%s4942_s30 + $0x504] ss:$8 sps:$4 sm:$0xff]   ;;  %v4145_v48 = vld [vmem:[%s4942_s30 + $0x400] ss:$8 sps:$4 sm:$0xff]  }
 0x189   : > { %3103 = vmatprep.subr.bf16.mxu1 %v4062_v49  ;;  %v4148_v49 = vld [vmem:[%s4942_s30 + $0x500] ss:$8 sps:$4 sm:$0xff]  }
 0x18b   : > { %3063 = vmatpush2.bf16.msra.mxu0 %v4057_v50  ;;  %v4153_v50 = vld [vmem:[%s4942_s30 + $0x4f4] ss:$8 sps:$4 sm:$0xff]  }
 0x18c   : > { %3104 = vmatpush2.bf16.msra.mxu1 %v4060_v51  ;;  %3064 = vmatprep.subr.bf16.mxu0 %v4065_v52  ;;  %v4156_v51 = vld [vmem:[%s4942_s30 + $0x5f4] ss:$8 sps:$4 sm:$0xff]   ;;  %v4151_v52 = vld [vmem:[%s4942_s30 + $0x4f0] ss:$8 sps:$4 sm:$0xff]  }
 0x18d   : > { %3105 = vmatprep.subr.bf16.mxu1 %v4068_v53  ;;  %v4154_v53 = vld [vmem:[%s4942_s30 + $0x5f0] ss:$8 sps:$4 sm:$0xff]  }
 0x18f   : > { %3065 = vmatpush2.bf16.msra.mxu0 %v4063_v54  ;;  %v4159_v54 = vld [vmem:[%s4942_s30 + $0x4e4] ss:$8 sps:$4 sm:$0xff]  }
 0x190   : > { %3106 = vmatpush2.bf16.msra.mxu1 %v4066_v55  ;;  %3066 = vmatprep.subr.bf16.mxu0 %v4071_v56  ;;  %v4162_v55 = vld [vmem:[%s4942_s30 + $0x5e4] ss:$8 sps:$4 sm:$0xff]   ;;  %v4157_v56 = vld [vmem:[%s4942_s30 + $0x4e0] ss:$8 sps:$4 sm:$0xff]  }
 0x191   : > { %3107 = vmatprep.subr.bf16.mxu1 %v4074_v57  ;;  %v4160_v57 = vld [vmem:[%s4942_s30 + $0x5e0] ss:$8 sps:$4 sm:$0xff]  }
 0x193   : > { %3067 = vmatpush2.bf16.msra.mxu0 %v4069_v58  ;;  %v4165_v58 = vld [vmem:[%s4942_s30 + $0x4d4] ss:$8 sps:$4 sm:$0xff]  }
 0x194   : > { %3108 = vmatpush2.bf16.msra.mxu1 %v4072_v59  ;;  %3068 = vmatprep.subr.bf16.mxu0 %v4077_v60  ;;  %v4168_v59 = vld [vmem:[%s4942_s30 + $0x5d4] ss:$8 sps:$4 sm:$0xff]   ;;  %v4163_v60 = vld [vmem:[%s4942_s30 + $0x4d0] ss:$8 sps:$4 sm:$0xff]  }
 0x195   : > { %3109 = vmatprep.subr.bf16.mxu1 %v4080_v61  ;;  %v4166_v61 = vld [vmem:[%s4942_s30 + $0x5d0] ss:$8 sps:$4 sm:$0xff]  }
 0x197   : > { %3069 = vmatpush2.bf16.msra.mxu0 %v4075_v62  ;;  %v4171_v62 = vld [vmem:[%s4942_s30 + $0x4c4] ss:$8 sps:$4 sm:$0xff]  }
 0x198   : > { %3110 = vmatpush2.bf16.msra.mxu1 %v4078_v63  ;;  %3070 = vmatprep.subr.bf16.mxu0 %v4083_v0  ;;  %v4174_v63 = vld [vmem:[%s4942_s30 + $0x5c4] ss:$8 sps:$4 sm:$0xff]   ;;  %v4169_v0 = vld [vmem:[%s4942_s30 + $0x4c0] ss:$8 sps:$4 sm:$0xff]  }
 0x199   : > { %3111 = vmatprep.subr.bf16.mxu1 %v4086_v1  ;;  %v4172_v1 = vld [vmem:[%s4942_s30 + $0x5c0] ss:$8 sps:$4 sm:$0xff]  }
 0x19b   : > { %3071 = vmatpush2.bf16.msra.mxu0 %v4081_v2  ;;  %v4177_v2 = vld [vmem:[%s4942_s30 + $0x4b4] ss:$8 sps:$4 sm:$0xff]  }
 0x19c   : > { %3112 = vmatpush2.bf16.msra.mxu1 %v4084_v3  ;;  %3072 = vmatprep.subr.bf16.mxu0 %v4089_v4  ;;  %v4180_v3 = vld [vmem:[%s4942_s30 + $0x5b4] ss:$8 sps:$4 sm:$0xff]   ;;  %v4175_v4 = vld [vmem:[%s4942_s30 + $0x4b0] ss:$8 sps:$4 sm:$0xff]  }
 0x19d   : > { %3113 = vmatprep.subr.bf16.mxu1 %v4092_v5  ;;  %v4178_v5 = vld [vmem:[%s4942_s30 + $0x5b0] ss:$8 sps:$4 sm:$0xff]  }
 0x19f   : > { %3073 = vmatpush2.bf16.msra.mxu0 %v4087_v6  ;;  %v4183_v6 = vld [vmem:[%s4942_s30 + $0x4a4] ss:$8 sps:$4 sm:$0xff]  }
 0x1a0   : > { %3114 = vmatpush2.bf16.msra.mxu1 %v4090_v7  ;;  %3074 = vmatprep.subr.bf16.mxu0 %v4095_v8  ;;  %v4186_v7 = vld [vmem:[%s4942_s30 + $0x5a4] ss:$8 sps:$4 sm:$0xff]   ;;  %v4181_v8 = vld [vmem:[%s4942_s30 + $0x4a0] ss:$8 sps:$4 sm:$0xff]  }
 0x1a1   : > { %3115 = vmatprep.subr.bf16.mxu1 %v4098_v9  ;;  %v4184_v9 = vld [vmem:[%s4942_s30 + $0x5a0] ss:$8 sps:$4 sm:$0xff]  }
 0x1a3   : > { %3075 = vmatpush2.bf16.msra.mxu0 %v4093_v10  ;;  %v4189_v10 = vld [vmem:[%s4942_s30 + $0x494] ss:$8 sps:$4 sm:$0xff]  }
 0x1a4   : > { %3116 = vmatpush2.bf16.msra.mxu1 %v4096_v11  ;;  %3126 = vmatprep.subr.bf16.mxu0 %v4105_v12  ;;  %v4192_v11 = vld [vmem:[%s4942_s30 + $0x594] ss:$8 sps:$4 sm:$0xff]   ;;  %v4187_v12 = vld [vmem:[%s4942_s30 + $0x490] ss:$8 sps:$4 sm:$0xff]  }
 0x1a5   : > { %3167 = vmatprep.subr.bf16.mxu1 %v4108_v13  ;;  %v4190_v13 = vld [vmem:[%s4942_s30 + $0x590] ss:$8 sps:$4 sm:$0xff]  }
 0x1a6   : > { %3077 = vmatmul.mubr.bf16.vlgmr.msra.gmra.mxu0 %v3570_v14  ;;  %v4195_v14 = vld [vmem:[%s4942_s30 + $0x484] ss:$8 sps:$4 sm:$0xff]  }
 0x1a7   : > { %3118 = vmatmul.mubr.bf16.vlgmr.msra.gmra.mxu1 %v3572_v15  ;;  %3127 = vmatpush1.bf16.msra.mxu0 %v4103_v16  ;;  %v4198_v15 = vld [vmem:[%s4942_s30 + $0x584] ss:$8 sps:$4 sm:$0xff]   ;;  %v4193_v16 = vld [vmem:[%s4942_s30 + $0x480] ss:$8 sps:$4 sm:$0xff]  }
 0x1a8   : > { %3168 = vmatpush1.bf16.msra.mxu1 %v4106_v17  ;;  %3128 = vmatprep.subr.bf16.mxu0 %v4111_v18  ;;  %v4196_v17 = vld [vmem:[%s4942_s30 + $0x580] ss:$8 sps:$4 sm:$0xff]   ;;  %v4205_v18 = vld [vmem:[%s4942_s30 + $0x674] ss:$8 sps:$4 sm:$0xff]  }
 0x1a9   : > { %3169 = vmatprep.subr.bf16.mxu1 %v4114_v19  ;;  %3158 = vmatprep.mubr.bf16.mxu0 %v3575_v22  ;;  %v4208_v19 = vld [vmem:[%s4942_s30 + $0x774] ss:$8 sps:$4 sm:$0xff]   ;;  %v3574_v22 = vcombine.low %v5106_v20, %v5106_v20  ;;  %v4206_v20 = vld [vmem:[%s4942_s30 + $0x770] ss:$8 sps:$4 sm:$0xff]  }
 0x1aa   : > { %3199 = vmatprep.mubr.bf16.mxu1 %v3577_v23  ;;  %v3576_v23 = vcombine.low %v5111_v21, %v5111_v21  ;;  %v4211_v21 = vld [vmem:[%s4942_s30 + $0x664] ss:$8 sps:$4 sm:$0xff]  }
 0x1ab   : > { %3129 = vmatpush1.bf16.msra.mxu0 %v4109_v24  ;;  %v5184_v24 = vld [vmem:[%s5323_s0 + $0x30] sm:$0xff] }
 0x1ac   : > { %3170 = vmatpush1.bf16.msra.mxu1 %v4112_v25  ;;  %3130 = vmatprep.subr.bf16.mxu0 %v4117_v26  ;;  %v5189_v25 = vld [vmem:[%s5323_s0 + $0x38] sm:$0xff] }
 0x1ad   : > { %3171 = vmatprep.subr.bf16.mxu1 %v4120_v27  ;;  %v4203_v26 = vld [vmem:[%s4942_s30 + $0x670] ss:$8 sps:$4 sm:$0xff]   ;;  %v4214_v27 = vld [vmem:[%s4942_s30 + $0x764] ss:$8 sps:$4 sm:$0xff]  }
 0x1af   : > { %3131 = vmatpush1.bf16.msra.mxu0 %v4115_v28  ;;  %v3579_v28 = vcombine.high %v5184_v24, %v5184_v24 }
 0x1b0   : > { %3172 = vmatpush1.bf16.msra.mxu1 %v4118_v29  ;;  %3132 = vmatprep.subr.bf16.mxu0 %v4123_v30  ;;  %v3581_v29 = vcombine.high %v5189_v25, %v5189_v25  ;;  %v4209_v30 = vld [vmem:[%s4942_s30 + $0x660] ss:$8 sps:$4 sm:$0xff]  }
 0x1b1   : > { %3173 = vmatprep.subr.bf16.mxu1 %v4126_v31  ;;  %v4212_v31 = vld [vmem:[%s4942_s30 + $0x760] ss:$8 sps:$4 sm:$0xff]  }
 0x1b3   : > { %3133 = vmatpush1.bf16.msra.mxu0 %v4121_v32  ;;  %v4217_v32 = vld [vmem:[%s4942_s30 + $0x654] ss:$8 sps:$4 sm:$0xff]  }
 0x1b4   : > { %3174 = vmatpush1.bf16.msra.mxu1 %v4124_v33  ;;  %3134 = vmatprep.subr.bf16.mxu0 %v4129_v34  ;;  %v4220_v33 = vld [vmem:[%s4942_s30 + $0x754] ss:$8 sps:$4 sm:$0xff]   ;;  %v4215_v34 = vld [vmem:[%s4942_s30 + $0x650] ss:$8 sps:$4 sm:$0xff]  }
 0x1b5   : > { %3175 = vmatprep.subr.bf16.mxu1 %v4132_v35  ;;  %v4218_v35 = vld [vmem:[%s4942_s30 + $0x750] ss:$8 sps:$4 sm:$0xff]  }
 0x1b7   : > { %3135 = vmatpush1.bf16.msra.mxu0 %v4127_v36  ;;  %v4223_v36 = vld [vmem:[%s4942_s30 + $0x644] ss:$8 sps:$4 sm:$0xff]  }
 0x1b8   : > { %3176 = vmatpush1.bf16.msra.mxu1 %v4130_v37  ;;  %3136 = vmatprep.subr.bf16.mxu0 %v4135_v38  ;;  %v4226_v37 = vld [vmem:[%s4942_s30 + $0x744] ss:$8 sps:$4 sm:$0xff]   ;;  %v4221_v38 = vld [vmem:[%s4942_s30 + $0x640] ss:$8 sps:$4 sm:$0xff]  }
 0x1b9   : > { %3177 = vmatprep.subr.bf16.mxu1 %v4138_v39  ;;  %v4224_v39 = vld [vmem:[%s4942_s30 + $0x740] ss:$8 sps:$4 sm:$0xff]  }
 0x1bb   : > { %3137 = vmatpush1.bf16.msra.mxu0 %v4133_v40  ;;  %v4229_v40 = vld [vmem:[%s4942_s30 + $0x634] ss:$8 sps:$4 sm:$0xff]  }
 0x1bc   : > { %3178 = vmatpush1.bf16.msra.mxu1 %v4136_v41  ;;  %3138 = vmatprep.subr.bf16.mxu0 %v4141_v42  ;;  %v4232_v41 = vld [vmem:[%s4942_s30 + $0x734] ss:$8 sps:$4 sm:$0xff]   ;;  %v4227_v42 = vld [vmem:[%s4942_s30 + $0x630] ss:$8 sps:$4 sm:$0xff]  }
 0x1bd   : > { %3179 = vmatprep.subr.bf16.mxu1 %v4144_v43  ;;  %v4230_v43 = vld [vmem:[%s4942_s30 + $0x730] ss:$8 sps:$4 sm:$0xff]  }
 0x1bf   : > { %3139 = vmatpush1.bf16.msra.mxu0 %v4139_v44  ;;  %v4235_v44 = vld [vmem:[%s4942_s30 + $0x624] ss:$8 sps:$4 sm:$0xff]  }
 0x1c0   : > { %3180 = vmatpush1.bf16.msra.mxu1 %v4142_v45  ;;  %3140 = vmatprep.subr.bf16.mxu0 %v4147_v46  ;;  %v4238_v45 = vld [vmem:[%s4942_s30 + $0x724] ss:$8 sps:$4 sm:$0xff]   ;;  %v4233_v46 = vld [vmem:[%s4942_s30 + $0x620] ss:$8 sps:$4 sm:$0xff]  }
 0x1c1   : > { %3181 = vmatprep.subr.bf16.mxu1 %v4150_v47  ;;  %v4236_v47 = vld [vmem:[%s4942_s30 + $0x720] ss:$8 sps:$4 sm:$0xff]  }
 0x1c3   : > { %3141 = vmatpush1.bf16.msra.mxu0 %v4145_v48  ;;  %v4241_v48 = vld [vmem:[%s4942_s30 + $0x614] ss:$8 sps:$4 sm:$0xff]  }
 0x1c4   : > { %3182 = vmatpush1.bf16.msra.mxu1 %v4148_v49  ;;  %3142 = vmatprep.subr.bf16.mxu0 %v4153_v50  ;;  %v4244_v49 = vld [vmem:[%s4942_s30 + $0x714] ss:$8 sps:$4 sm:$0xff]   ;;  %v4239_v50 = vld [vmem:[%s4942_s30 + $0x610] ss:$8 sps:$4 sm:$0xff]  }
 0x1c5   : > { %3183 = vmatprep.subr.bf16.mxu1 %v4156_v51  ;;  %v4242_v51 = vld [vmem:[%s4942_s30 + $0x710] ss:$8 sps:$4 sm:$0xff]  }
 0x1c7   : > { %3143 = vmatpush2.bf16.msra.mxu0 %v4151_v52  ;;  %v4247_v52 = vld [vmem:[%s4942_s30 + $0x604] ss:$8 sps:$4 sm:$0xff]  }
 0x1c8   : > { %3184 = vmatpush2.bf16.msra.mxu1 %v4154_v53  ;;  %3144 = vmatprep.subr.bf16.mxu0 %v4159_v54  ;;  %v4250_v53 = vld [vmem:[%s4942_s30 + $0x704] ss:$8 sps:$4 sm:$0xff]   ;;  %v4245_v54 = vld [vmem:[%s4942_s30 + $0x600] ss:$8 sps:$4 sm:$0xff]  }
 0x1c9   : > { %3185 = vmatprep.subr.bf16.mxu1 %v4162_v55  ;;  %v4248_v55 = vld [vmem:[%s4942_s30 + $0x700] ss:$8 sps:$4 sm:$0xff]  }
 0x1cb   : > { %3145 = vmatpush2.bf16.msra.mxu0 %v4157_v56  ;;  %v4253_v56 = vld [vmem:[%s4942_s30 + $0x6f4] ss:$8 sps:$4 sm:$0xff]  }
 0x1cc   : > { %3186 = vmatpush2.bf16.msra.mxu1 %v4160_v57  ;;  %3146 = vmatprep.subr.bf16.mxu0 %v4165_v58  ;;  %v4256_v57 = vld [vmem:[%s4942_s30 + $0x7f4] ss:$8 sps:$4 sm:$0xff]   ;;  %v4251_v58 = vld [vmem:[%s4942_s30 + $0x6f0] ss:$8 sps:$4 sm:$0xff]  }
 0x1cd   : > { %3187 = vmatprep.subr.bf16.mxu1 %v4168_v59  ;;  %v4254_v59 = vld [vmem:[%s4942_s30 + $0x7f0] ss:$8 sps:$4 sm:$0xff]  }
 0x1cf   : > { %3147 = vmatpush2.bf16.msra.mxu0 %v4163_v60  ;;  %v4259_v60 = vld [vmem:[%s4942_s30 + $0x6e4] ss:$8 sps:$4 sm:$0xff]  }
 0x1d0   : > { %3188 = vmatpush2.bf16.msra.mxu1 %v4166_v61  ;;  %3148 = vmatprep.subr.bf16.mxu0 %v4171_v62  ;;  %v4262_v61 = vld [vmem:[%s4942_s30 + $0x7e4] ss:$8 sps:$4 sm:$0xff]   ;;  %v4257_v62 = vld [vmem:[%s4942_s30 + $0x6e0] ss:$8 sps:$4 sm:$0xff]  }
 0x1d1   : > { %3189 = vmatprep.subr.bf16.mxu1 %v4174_v63  ;;  %v4260_v63 = vld [vmem:[%s4942_s30 + $0x7e0] ss:$8 sps:$4 sm:$0xff]  }
 0x1d3   : > { %3149 = vmatpush2.bf16.msra.mxu0 %v4169_v0  ;;  %v4265_v0 = vld [vmem:[%s4942_s30 + $0x6d4] ss:$8 sps:$4 sm:$0xff]  }
 0x1d4   : > { %3190 = vmatpush2.bf16.msra.mxu1 %v4172_v1  ;;  %3150 = vmatprep.subr.bf16.mxu0 %v4177_v2  ;;  %v4268_v1 = vld [vmem:[%s4942_s30 + $0x7d4] ss:$8 sps:$4 sm:$0xff]   ;;  %v4263_v2 = vld [vmem:[%s4942_s30 + $0x6d0] ss:$8 sps:$4 sm:$0xff]  }
 0x1d5   : > { %3191 = vmatprep.subr.bf16.mxu1 %v4180_v3  ;;  %v4266_v3 = vld [vmem:[%s4942_s30 + $0x7d0] ss:$8 sps:$4 sm:$0xff]  }
 0x1d7   : > { %3151 = vmatpush2.bf16.msra.mxu0 %v4175_v4  ;;  %v4271_v4 = vld [vmem:[%s4942_s30 + $0x6c4] ss:$8 sps:$4 sm:$0xff]  }
 0x1d8   : > { %3192 = vmatpush2.bf16.msra.mxu1 %v4178_v5  ;;  %3152 = vmatprep.subr.bf16.mxu0 %v4183_v6  ;;  %v4274_v5 = vld [vmem:[%s4942_s30 + $0x7c4] ss:$8 sps:$4 sm:$0xff]   ;;  %v4269_v6 = vld [vmem:[%s4942_s30 + $0x6c0] ss:$8 sps:$4 sm:$0xff]  }
 0x1d9   : > { %3193 = vmatprep.subr.bf16.mxu1 %v4186_v7  ;;  %v4272_v7 = vld [vmem:[%s4942_s30 + $0x7c0] ss:$8 sps:$4 sm:$0xff]  }
 0x1db   : > { %3153 = vmatpush2.bf16.msra.mxu0 %v4181_v8  ;;  %v4277_v8 = vld [vmem:[%s4942_s30 + $0x6b4] ss:$8 sps:$4 sm:$0xff]  }
 0x1dc   : > { %3194 = vmatpush2.bf16.msra.mxu1 %v4184_v9  ;;  %3154 = vmatprep.subr.bf16.mxu0 %v4189_v10  ;;  %v4280_v9 = vld [vmem:[%s4942_s30 + $0x7b4] ss:$8 sps:$4 sm:$0xff]   ;;  %v4275_v10 = vld [vmem:[%s4942_s30 + $0x6b0] ss:$8 sps:$4 sm:$0xff]  }
 0x1dd   : > { %3195 = vmatprep.subr.bf16.mxu1 %v4192_v11  ;;  %v4278_v11 = vld [vmem:[%s4942_s30 + $0x7b0] ss:$8 sps:$4 sm:$0xff]  }
 0x1df   : > { %3155 = vmatpush2.bf16.msra.mxu0 %v4187_v12  ;;  %v4283_v12 = vld [vmem:[%s4942_s30 + $0x6a4] ss:$8 sps:$4 sm:$0xff]  }
 0x1e0   : > { %3196 = vmatpush2.bf16.msra.mxu1 %v4190_v13  ;;  %3156 = vmatprep.subr.bf16.mxu0 %v4195_v14  ;;  %v4286_v13 = vld [vmem:[%s4942_s30 + $0x7a4] ss:$8 sps:$4 sm:$0xff]   ;;  %v4281_v14 = vld [vmem:[%s4942_s30 + $0x6a0] ss:$8 sps:$4 sm:$0xff]  }
 0x1e1   : > { %3197 = vmatprep.subr.bf16.mxu1 %v4198_v15  ;;  %v4284_v15 = vld [vmem:[%s4942_s30 + $0x7a0] ss:$8 sps:$4 sm:$0xff]  }
 0x1e3   : > { %3157 = vmatpush2.bf16.msra.mxu0 %v4193_v16  ;;  %v4289_v16 = vld [vmem:[%s4942_s30 + $0x694] ss:$8 sps:$4 sm:$0xff]  }
 0x1e4   : > { %3198 = vmatpush2.bf16.msra.mxu1 %v4196_v17  ;;  %3208 = vmatprep.subr.bf16.mxu0 %v4205_v18  ;;  %v4292_v17 = vld [vmem:[%s4942_s30 + $0x794] ss:$8 sps:$4 sm:$0xff]   ;;  %v4287_v18 = vld [vmem:[%s4942_s30 + $0x690] ss:$8 sps:$4 sm:$0xff]  }
 0x1e5   : > { %3249 = vmatprep.subr.bf16.mxu1 %v4208_v19  ;;  %v4290_v19 = vld [vmem:[%s4942_s30 + $0x790] ss:$8 sps:$4 sm:$0xff]  }
 0x1e6   : > { %3159 = vmatmul.mubr.bf16.vlgmr.msra.gmra.mxu0 %v3574_v22  ;;  %v4295_v22 = vld [vmem:[%s4942_s30 + $0x684] ss:$8 sps:$4 sm:$0xff]  }
 0x1e7   : > { %3200 = vmatmul.mubr.bf16.vlgmr.msra.gmra.mxu1 %v3576_v23  ;;  %3209 = vmatpush1.bf16.msra.mxu0 %v4203_v26  ;;  %v4298_v23 = vld [vmem:[%s4942_s30 + $0x784] ss:$8 sps:$4 sm:$0xff]   ;;  %v4293_v26 = vld [vmem:[%s4942_s30 + $0x680] ss:$8 sps:$4 sm:$0xff]  }
 0x1e8   : > { %3250 = vmatpush1.bf16.msra.mxu1 %v4206_v20  ;;  %3210 = vmatprep.subr.bf16.mxu0 %v4211_v21  ;;  %v4296_v20 = vld [vmem:[%s4942_s30 + $0x780] ss:$8 sps:$4 sm:$0xff]   ;;  %v3578_v21 = vcombine.low %v5184_v24, %v5184_v24 }
 0x1e9   : > { %3251 = vmatprep.subr.bf16.mxu1 %v4214_v27  ;;  %3240 = vmatprep.mubr.bf16.mxu0 %v3579_v28  ;;  %v3580_v27 = vcombine.low %v5189_v25, %v5189_v25 }
 0x1ea   : > { %3281 = vmatprep.mubr.bf16.mxu1 %v3581_v29 }
 0x1eb   : > { %3211 = vmatpush1.bf16.msra.mxu0 %v4209_v30 }
 0x1ec   : > { %3252 = vmatpush1.bf16.msra.mxu1 %v4212_v31  ;;  %3212 = vmatprep.subr.bf16.mxu0 %v4217_v32 }
 0x1ed   : > { %3253 = vmatprep.subr.bf16.mxu1 %v4220_v33 }
 0x1ef   : > { %3213 = vmatpush1.bf16.msra.mxu0 %v4215_v34 }
 0x1f0   : > { %3254 = vmatpush1.bf16.msra.mxu1 %v4218_v35  ;;  %3214 = vmatprep.subr.bf16.mxu0 %v4223_v36 }
 0x1f1   : > { %3255 = vmatprep.subr.bf16.mxu1 %v4226_v37 }
 0x1f3   : > { %3215 = vmatpush1.bf16.msra.mxu0 %v4221_v38 }
 0x1f4   : > { %3256 = vmatpush1.bf16.msra.mxu1 %v4224_v39  ;;  %3216 = vmatprep.subr.bf16.mxu0 %v4229_v40 }
 0x1f5   : > { %3257 = vmatprep.subr.bf16.mxu1 %v4232_v41 }
 0x1f7   : > { %3217 = vmatpush1.bf16.msra.mxu0 %v4227_v42 }
 0x1f8   : > { %3258 = vmatpush1.bf16.msra.mxu1 %v4230_v43  ;;  %3218 = vmatprep.subr.bf16.mxu0 %v4235_v44 }
 0x1f9   : > { %3259 = vmatprep.subr.bf16.mxu1 %v4238_v45 }
 0x1fb   : > { %3219 = vmatpush1.bf16.msra.mxu0 %v4233_v46 }
 0x1fc   : > { %3260 = vmatpush1.bf16.msra.mxu1 %v4236_v47  ;;  %3220 = vmatprep.subr.bf16.mxu0 %v4241_v48  ;;  %v3401_v48 = vld [vmem:[%s4940_s28 + $0xf8] sm:$0xff] }
 0x1fd   : > { %3261 = vmatprep.subr.bf16.mxu1 %v4244_v49  ;;  %v3385_v49 = vld [vmem:[%s4940_s28 + $0x78] sm:$0xff] }
 0x1ff   : > { %3221 = vmatpush1.bf16.msra.mxu0 %v4239_v50  ;;  %v3400_v50 = vld [vmem:[%s4940_s28 + $0xf0] sm:$0xff] }
 0x200   : > { %3262 = vmatpush1.bf16.msra.mxu1 %v4242_v51  ;;  %3222 = vmatprep.subr.bf16.mxu0 %v4247_v52  ;;  %v3384_v51 = vld [vmem:[%s4940_s28 + $0x70] sm:$0xff]  ;;  %v3399_v52 = vld [vmem:[%s4940_s28 + $0xe8] sm:$0xff] }
 0x201   : > { %3263 = vmatprep.subr.bf16.mxu1 %v4250_v53  ;;  %v3383_v53 = vld [vmem:[%s4940_s28 + $0x68] sm:$0xff] }
 0x203   : > { %3223 = vmatpush1.bf16.msra.mxu0 %v4245_v54  ;;  %v3398_v54 = vld [vmem:[%s4940_s28 + $0xe0] sm:$0xff] }
 0x204   : > { %3264 = vmatpush1.bf16.msra.mxu1 %v4248_v55  ;;  %3224 = vmatprep.subr.bf16.mxu0 %v4253_v56  ;;  %v3382_v55 = vld [vmem:[%s4940_s28 + $0x60] sm:$0xff]  ;;  %v3397_v56 = vld [vmem:[%s4940_s28 + $0xd8] sm:$0xff] }
 0x205   : > { %3265 = vmatprep.subr.bf16.mxu1 %v4256_v57  ;;  %v3381_v57 = vld [vmem:[%s4940_s28 + $0x58] sm:$0xff] }
 0x207   : > { %3225 = vmatpush2.bf16.msra.mxu0 %v4251_v58  ;;  %v3396_v58 = vld [vmem:[%s4940_s28 + $0xd0] sm:$0xff] }
 0x208   : > { %3266 = vmatpush2.bf16.msra.mxu1 %v4254_v59  ;;  %3226 = vmatprep.subr.bf16.mxu0 %v4259_v60  ;;  %v3380_v59 = vld [vmem:[%s4940_s28 + $0x50] sm:$0xff]  ;;  %v3395_v60 = vld [vmem:[%s4940_s28 + $0xc8] sm:$0xff] }
 0x209   : > { %3267 = vmatprep.subr.bf16.mxu1 %v4262_v61  ;;  %v3379_v61 = vld [vmem:[%s4940_s28 + $0x48] sm:$0xff] }
 0x20b   : > { %3227 = vmatpush2.bf16.msra.mxu0 %v4257_v62  ;;  %v3394_v62 = vld [vmem:[%s4940_s28 + $0xc0] sm:$0xff] }
 0x20c   : > { %3268 = vmatpush2.bf16.msra.mxu1 %v4260_v63  ;;  %3228 = vmatprep.subr.bf16.mxu0 %v4265_v0  ;;  %v3378_v63 = vld [vmem:[%s4940_s28 + $0x40] sm:$0xff]  ;;  %v3393_v0 = vld [vmem:[%s4940_s28 + $0xb8] sm:$0xff] }
 0x20d   : > { %3269 = vmatprep.subr.bf16.mxu1 %v4268_v1  ;;  %v3377_v1 = vld [vmem:[%s4940_s28 + $0x38] sm:$0xff] }
 0x20f   : > { %3229 = vmatpush2.bf16.msra.mxu0 %v4263_v2  ;;  %v3392_v2 = vld [vmem:[%s4940_s28 + $0xb0] sm:$0xff] }
 0x210   : > { %3270 = vmatpush2.bf16.msra.mxu1 %v4266_v3  ;;  %3230 = vmatprep.subr.bf16.mxu0 %v4271_v4  ;;  %v3376_v3 = vld [vmem:[%s4940_s28 + $0x30] sm:$0xff]  ;;  %v3391_v4 = vld [vmem:[%s4940_s28 + $0xa8] sm:$0xff] }
 0x211   : > { %3271 = vmatprep.subr.bf16.mxu1 %v4274_v5  ;;  %v3375_v5 = vld [vmem:[%s4940_s28 + $0x28] sm:$0xff] }
 0x213   : > { %3231 = vmatpush2.bf16.msra.mxu0 %v4269_v6  ;;  %v3390_v6 = vld [vmem:[%s4940_s28 + $0xa0] sm:$0xff] }
 0x214   : > { %3272 = vmatpush2.bf16.msra.mxu1 %v4272_v7  ;;  %3232 = vmatprep.subr.bf16.mxu0 %v4277_v8  ;;  %v3374_v7 = vld [vmem:[%s4940_s28 + $0x20] sm:$0xff]  ;;  %v3389_v8 = vld [vmem:[%s4940_s28 + $0x98] sm:$0xff] }
 0x215   : > { %3273 = vmatprep.subr.bf16.mxu1 %v4280_v9  ;;  %v3373_v9 = vld [vmem:[%s4940_s28 + $0x18] sm:$0xff] }
 0x217   : > { %3233 = vmatpush2.bf16.msra.mxu0 %v4275_v10  ;;  %v3388_v10 = vld [vmem:[%s4940_s28 + $0x90] sm:$0xff] }
 0x218   : > { %3274 = vmatpush2.bf16.msra.mxu1 %v4278_v11  ;;  %3234 = vmatprep.subr.bf16.mxu0 %v4283_v12  ;;  %v3372_v11 = vld [vmem:[%s4940_s28 + $0x10] sm:$0xff]  ;;  %v3387_v12 = vld [vmem:[%s4940_s28 + $0x88] sm:$0xff] }
 0x219   : > { %3275 = vmatprep.subr.bf16.mxu1 %v4286_v13  ;;  %v3371_v13 = vld [vmem:[%s4940_s28 + $0x8] sm:$0xff] }
 0x21b   : > { %3235 = vmatpush2.bf16.msra.mxu0 %v4281_v14  ;;  %v3386_v14 = vld [vmem:[%s4940_s28 + $0x80] sm:$0xff] }
 0x21c   : > { %3276 = vmatpush2.bf16.msra.mxu1 %v4284_v15  ;;  %3236 = vmatprep.subr.bf16.mxu0 %v4289_v16  ;;  %v3370_v15 = vld [vmem:[%s4940_s28] sm:$0xff] }
 0x21d   : > { %3277 = vmatprep.subr.bf16.mxu1 %v4292_v17 }
 0x21f   : > { %3237 = vmatpush2.bf16.msra.mxu0 %v4287_v18 }
 0x220   : > { %3278 = vmatpush2.bf16.msra.mxu1 %v4290_v19  ;;  %3238 = vmatprep.subr.bf16.mxu0 %v4295_v22 }
 0x221   : > { %3279 = vmatprep.subr.bf16.mxu1 %v4298_v23 }
 0x223   : > { %3239 = vmatpush2.bf16.msra.mxu0 %v4293_v26 }
 0x224   : > { %3280 = vmatpush2.bf16.msra.mxu1 %v4296_v20  ;;  %3843 = vmatprep.subr.mxu0 %v3401_v48 }
 0x226   : > { %v2996_v28 = vpop.f32.mrf.mxu0  ;;  %3241 = vmatmul.mubr.bf16.vlgmr.msra.gmra.mxu0 %v3578_v21 }
 0x227   : > { %v3037_v29 = vpop.f32.mrf.mxu1  ;;  %3282 = vmatmul.mubr.bf16.vlgmr.msra.gmra.mxu1 %v3580_v27  ;;  %3844 = vmatpush3.msra.mxu0 %v3385_v49 }
 0x228   : > { %v3038_v30 = vadd.f32 %v3037_v29, %v2996_v28  ;;  %v2998_v31 = vpop.f32.mrf.mxu0  ;;  %3845 = vmatprep.subr.mxu0 %v3400_v50 }
 0x229   : > { %v3039_v32 = vpop.f32.mrf.mxu1  ;;  %3846 = vmatpush3.msra.mxu0 %v3384_v51 }
 0x22a   : > { %v3040_v33 = vadd.f32 %v3039_v32, %v2998_v31  ;;  %v3000_v34 = vpop.f32.mrf.mxu0  ;;  %3847 = vmatprep.subr.mxu0 %v3399_v52 }
 0x22b   : > { %v3041_v35 = vpop.f32.mrf.mxu1  ;;  %3848 = vmatpush3.msra.mxu0 %v3383_v53 }
 0x22c   : > { %v3001_v36 = vpop.f32.mrf.mxu0  ;;  %3849 = vmatprep.subr.mxu0 %v3398_v54 }
 0x22d   : > { %v3042_v37 = vpop.f32.mrf.mxu1  ;;  %3850 = vmatpush3.msra.mxu0 %v3382_v55 }
 0x22e   : > { %3851 = vmatprep.subr.mxu0 %v3397_v56 }
 0x22f   : > { %3852 = vmatpush3.msra.mxu0 %v3381_v57 }
 0x230   : > { %3853 = vmatprep.subr.mxu0 %v3396_v58 }
 0x231   : > { %3854 = vmatpush3.msra.mxu0 %v3380_v59 }
 0x232   : > { %3855 = vmatprep.subr.mxu0 %v3395_v60 }
 0x233   : > { %3856 = vmatpush3.msra.mxu0 %v3379_v61 }
 0x234   : > { %3857 = vmatprep.subr.mxu0 %v3394_v62 }
 0x235   : > { %3858 = vmatpush3.msra.mxu0 %v3378_v63 }
 0x236   : > { %3859 = vmatprep.subr.mxu0 %v3393_v0 }
 0x237   : > { %3860 = vmatpush3.msra.mxu0 %v3377_v1 }
 0x238   : > { %3861 = vmatprep.subr.mxu0 %v3392_v2 }
 0x239   : > { %3862 = vmatpush3.msra.mxu0 %v3376_v3 }
 0x23a   : > { %3863 = vmatprep.subr.mxu0 %v3391_v4 }
 0x23b   : > { %3864 = vmatpush3.msra.mxu0 %v3375_v5 }
 0x23c   : > { %3865 = vmatprep.subr.mxu0 %v3390_v6 }
 0x23d   : > { %3866 = vmatpush3.msra.mxu0 %v3374_v7 }
 0x23e   : > { %3867 = vmatprep.subr.mxu0 %v3389_v8 }
 0x23f   : > { %3868 = vmatpush3.msra.mxu0 %v3373_v9 }
 0x240   : > { %3869 = vmatprep.subr.mxu0 %v3388_v10 }
 0x241   : > { %3870 = vmatpush3.msra.mxu0 %v3372_v11 }
 0x242   : > { %3871 = vmatprep.subr.mxu0 %v3387_v12 }
 0x243   : > { %3872 = vmatpush3.msra.mxu0 %v3371_v13  ;;  %v3337_v13 = vlaneseq }
 0x244   : > { %3873 = vmatprep.subr.mxu0 %v3386_v14 }
 0x245   : > { %3874 = vmatpush3.msra.mxu0 %v3370_v15  ;;  %v3338_v15 = vshrl.u32 %v3337_v13, 7 }
 0x266   : > { %v3078_v24 = vpop.f32.mrf.mxu0 }
 0x267   : > { %v3119_v38 = vpop.f32.mrf.mxu1  ;;  %v3079_v25 = vadd.f32 %v3078_v24, %v3038_v30 }
 0x268   : > { %v3080_v39 = vpop.f32.mrf.mxu0 }
 0x269   : > { %v3121_v40 = vpop.f32.mrf.mxu1  ;;  %v5261_v41 = vadd.f32 %v3119_v38, %v3079_v25  ;;  %v3081_v42 = vadd.f32 %v3080_v39, %v3040_v33 }
 0x26a   : > { %v3082_v43 = vpop.f32.mrf.mxu0 }
 0x26b   : > { %v3123_v44 = vpop.f32.mrf.mxu1  ;;  %v5263_v45 = vadd.f32 %v3121_v40, %v3081_v42 }
 0x26c   : > { %v3083_v46 = vpop.f32.mrf.mxu0 }
 0x26d   : > { %v3124_v47 = vpop.f32.mrf.mxu1 }
 0x2a6   : > { %v3160_v16 = vpop.f32.mrf.mxu0 }
 0x2a7   : > { %v3201_v17 = vpop.f32.mrf.mxu1  ;;  %v3161_v18 = vadd.f32 %v3160_v16, %v5261_v41  ;;  %v3339_v16 = vsub.s32 0, %v3338_v15 }
 0x2a8   : > { %v3162_v19 = vpop.f32.mrf.mxu0 }
 0x2a9   : > { %v3203_v22 = vpop.f32.mrf.mxu1  ;;  %v3202_v23 = vadd.f32 %v3201_v17, %v3161_v18  ;;  %v3163_v28 = vadd.f32 %v3162_v19, %v5263_v45  ;;  %v3335_v17 = vld [vmem:[%s1343_s19] sm:$0x3]  ;;  %v3343_v18 = vsub.s32 1, %v3338_v15 }
 0x2aa   : > { %v3164_v26 = vpop.f32.mrf.mxu0  ;;  %v3349_v19 = vld [vmem:[%s1348_s22] sm:$0x3] }
 0x2ab   : > { %v3205_v20 = vpop.f32.mrf.mxu1  ;;  %v3204_v31 = vadd.f32 %v3203_v22, %v3163_v28  ;;  %v3344_v28 = vrot.slane %v3335_v17, %v3343_v18 }
 0x2ac   : > { %v3165_v21 = vpop.f32.mrf.mxu0 }
 0x2ad   : > { %v3206_v27 = vpop.f32.mrf.mxu1  ;;  %v3354_v21 = vrot.slane %v3349_v19, %v3339_v16 }
 0x2e6   : > { %v3242_v29 = vpop.f32.mrf.mxu0 }
 0x2e7   : > { %v3283_v30 = vpop.f32.mrf.mxu1  ;;  %v3243_v32 = vadd.f32 %v3242_v29, %v3202_v23  ;;  %v3340_v23 = vrot.slane %v3335_v17, %v3339_v16 }
 0x2e8   : > { %v3244_v33 = vpop.f32.mrf.mxu0 }
 0x2e9   : > { %v3285_v34 = vpop.f32.mrf.mxu1  ;;  %v3284_v35 = vadd.f32 %v3283_v30, %v3243_v32  ;;  %v3245_v36 = vadd.f32 %v3244_v33, %v3204_v31  ;;  %v3358_v32 = vrot.slane %v3349_v19, %v3343_v18 }
 0x2ea   : > { %v3246_v37 = vpop.f32.mrf.mxu0 }
 0x2eb   : > { %v3287_v24 = vpop.f32.mrf.mxu1  ;;  %v3290_v38 = vrot.slane %v3284_v35, 4  ;;  %v3305_v25 = vmul.f32 %v3284_v35, %v3284_v35  ;;  %v3286_v39 = vadd.f32 %v3285_v34, %v3245_v36 }
 0x2ec   : > { %v3247_v40 = vpop.f32.mrf.mxu0 }
 0x2ed   : > { %v3288_v41 = vpop.f32.mrf.mxu1  ;;  %v3291_v42 = vadd.f32 %v3290_v38, %v3284_v35  ;;  %v3307_v43 = vrot.slane %v3305_v25, 4  ;;  %v3296_v44 = vrot.slane %v3286_v39, 4  ;;  %v3306_v46 = vmul.f32 %v3286_v39, %v3286_v39  ;;  %v3369_v40 = vld [vmem:[#allocation2] sm:$0xff] }
 0x2ef   : > { %v3292_v45 = vrot.slane %v3291_v42, 2  ;;  %v3308_v47 = vadd.f32 %v3307_v43, %v3305_v25  ;;  %v3297_v48 = vadd.f32 %v3296_v44, %v3286_v39  ;;  %v3313_v49 = vrot.slane %v3306_v46, 4 }
 0x2f1   : > { %v3293_v50 = vadd.f32 %v3292_v45, %v3291_v42  ;;  %v3309_v51 = vrot.slane %v3308_v47, 2  ;;  %v3298_v52 = vrot.slane %v3297_v48, 2  ;;  %v3314_v53 = vadd.f32 %v3313_v49, %v3306_v46 }
 0x2f3   : > { %v3294_v54 = vrot.slane %v3293_v50, 1  ;;  %v3310_v55 = vadd.f32 %v3309_v51, %v3308_v47  ;;  %v3299_v56 = vadd.f32 %v3298_v52, %v3297_v48  ;;  %v3315_v57 = vrot.slane %v3314_v53, 2 }
 0x2f5   : > { %v3295_v58 = vadd.f32 %v3294_v54, %v3293_v50  ;;  %v3311_v59 = vrot.slane %v3310_v55, 1  ;;  %v3300_v60 = vrot.slane %v3299_v56, 1  ;;  %v3316_v61 = vadd.f32 %v3315_v57, %v3314_v53 }
 0x2f7   : > { %v3303_v62 = vmul.f32 0.125, %v3295_v58  ;;  %v3312_v63 = vadd.f32 %v3311_v59, %v3310_v55  ;;  %v3301_v0 = vadd.f32 %v3300_v60, %v3299_v56  ;;  %v3317_v1 = vrot.slane %v3316_v61, 1 }
 0x2f9   : > { %v3319_v2 = vmul.f32 0.125, %v3312_v63  ;;  %v3321_v3 = vmul.f32 %v3303_v62, %v3303_v62  ;;  %v3304_v4 = vmul.f32 0.125, %v3301_v0  ;;  %v3318_v5 = vadd.f32 %v3317_v1, %v3316_v61 }
 0x2fa   : > { %v3327_v22 = vsub.f32 %v3284_v35, %v3303_v62 }
 0x2fb   : > { %v3323_v6 = vsub.f32 %v3319_v2, %v3321_v3  ;;  %v3322_v7 = vmul.f32 %v3304_v4, %v3304_v4  ;;  %v3320_v8 = vmul.f32 0.125, %v3318_v5  ;;  %v3328_v27 = vsub.f32 %v3286_v39, %v3304_v4 }
 0x2fd   : > { %v3325_v9 = vmax.f32 %v3323_v6, 0.0  ;;  %v3324_v10 = vsub.f32 %v3320_v8, %v3322_v7 }
 0x2ff   : > { %v3329_v11 = vadd.f32 1e-05, %v3325_v9  ;;  %v3326_v12 = vmax.f32 %v3324_v10, 0.0 }
 0x301   : > { %4303 = vrsqrt.f32 %v3329_v11  ;;  %v3330_v14 = vadd.f32 1e-05, %v3326_v12 }
 0x303   : > { %4305 = vrsqrt.f32 %v3330_v14 }
 0x30e   : > { %v4304_v26 = vpop.eup %4303 }
 0x30f   : > { %v3333_v20 = vmul.f32 %v4304_v26, %v3327_v22 }
 0x310   : > { %v4306_v29 = vpop.eup %4305 }
 0x311   : > { %v3347_v30 = vmul.f32 %v3340_v23, %v3333_v20  ;;  %v3334_v31 = vmul.f32 %v4306_v29, %v3328_v27 }
 0x313   : > { %v3361_v33 = vadd.f32 %v3354_v21, %v3347_v30  ;;  %v3348_v34 = vmul.f32 %v3344_v28, %v3334_v31 }
 0x315   : > { %v3362_v36 = vadd.f32 %v3358_v32, %v3348_v34  ;;  %v3365_v37 = vmul.f32 0.1, %v3361_v33  ;;  %vm3363_vm2 = vcmp.ge.f32.partialorder %v3361_v33, 0.0 }
 0x317   : > { %vm3364_vm1 = vcmp.ge.f32.partialorder %v3362_v36, 0.0  ;;  %v3366_v24 = vmul.f32 0.1, %v3362_v36  ;;  %v3367_v35 = vsel %vm3363_vm2, %v3361_v33, %v3365_v37 }
 0x319   : > { %v3368_v38 = vsel %vm3364_vm1, %v3362_v36, %v3366_v24 }
 0x31a   : > { %3466 = vmatprep.mubr.f32.mxu0 %v3368_v38 }
 0x31b   : > { %3467 = vmatmul.mubr.f32.vlgmr.msra.gmra.mxu0 %v3367_v35 }
 0x3db   : > { %v3875_v25 = vpop.f32.mrf.mxu0 }
 0x3dd   : > { %v3876_v41 = vpop.f32.mrf.mxu0 }
 0x3de   : > { %v3877_v39 = vadd.f32 %v3876_v41, %v3875_v25  ;;  %3478 = sbr.rel (%p3838_p11) target bundleno = 1005 (0x3ed), region = 90 }
 0x3e0   : > { %v3472_v42 = vadd.f32 %v3877_v39, %v3369_v40 }
 0x3e2   : > { %3474 = vst.msk [vmem:[#allocation2] sm:$0xff] %vm3473_vm3, %v3472_v42 }
 0x3e3   : > { %v3839_v44 = vld [vmem:[#allocation3] ss:$0 sm:$0xff] }
 0x3e9   : > { %v3479_v43 = vld [vmem:[#allocation2] sm:$0xff] }
 0x3ea   : > { %v3487_v46 = vadd.f32 %v3839_v44, %v3479_v43 }
 0x3ec   : > { %3488 = vst.msk [vmem:[%s5329_s6] sm:$0xff] %vm3473_vm3, %v3487_v46 }
 0x3ed PF: > { %p15_p12 = scmp.ge.s32.totalorder %s4389_s26, 6   ;;  %s5330_s23 = smov %s4325_s24 }
 0x3ee   : > { %s5331_s24 = smov %s4398_s29  ;;  %s5332_s25 = smov %s4389_s26 }
 0x3ef   :  { %17 = sbr.rel (!%p15_p12) target bundleno = 5 (0x5), region = 130 }

</bundles_post_ra>
